<compile_context>
chip_gen: v7x
topology: tpu7x:2x2x1
jax: 0.10.0
libtpu: 0.0.40
codegen_flags: <defaults>
</compile_context>

<pallas_src>
import functools
import math

import jax
import jax.numpy as jnp
from jax.experimental import pallas as pl
from jax.experimental.pallas import tpu as pltpu


# Finite "-inf" for masking.  NOTE: PyTorch's -inf masking would produce NaN
# rows when a query is fully masked; with a finite value such rows softmax to
# uniform instead (no fully-masked rows exist in this setup).
_NEG_BIG = -1e30
_VMEM_LIMIT = 32 * 1024 * 1024   # explicit budget, safe on v5e/v6e/v7x


def _ln(x, gamma, beta, eps):
    """LayerNorm over the last axis (f32 math)."""
    mu = jnp.mean(x, axis=-1, keepdims=True)
    var = jnp.mean((x - mu) ** 2, axis=-1, keepdims=True)
    return (x - mu) * jax.lax.rsqrt(var + eps) * gamma + beta


# --------------------------------------------------------------------------
# Fused attention sub-block kernel
#   (optional pre-LN) -> QKV proj -> per-head attention -> out proj
#   -> residual add -> (post-LN)
# One grid step per batch element; all heads computed per step.
# --------------------------------------------------------------------------

def _attn_block_kernel(*refs, nhead, scale, eps, pre_norm, self_attn):
    if self_attn:
        (x_ref, wqkv_ref, bqkv_ref, wo_ref, bo_ref,
         g_ref, b_ref, mask_ref, pad_ref, o_ref) = refs
        kv_ref = None
    else:
        (x_ref, kv_ref, wqkv_ref, bqkv_ref, wo_ref, bo_ref,
         g_ref, b_ref, mask_ref, pad_ref, o_ref) = refs

    E = x_ref.shape[-1]
    Dh = E // nhead

    x = x_ref[0].astype(jnp.float32)            # (L, E) residual
    gamma = g_ref[...].astype(jnp.float32)      # (1, E)
    beta = b_ref[...].astype(jnp.float32)       # (1, E)

    y = _ln(x, gamma, beta, eps) if pre_norm else x

    wqkv = wqkv_ref[...]                        # (E, 3E) packed [Wq|Wk|Wv]
    bqkv = bqkv_ref[...]                        # (1, 3E)

    if self_attn:
        # single packed QKV matmul
        qkv = jnp.dot(y, wqkv, preferred_element_type=jnp.float32) + bqkv
        q = qkv[:, :E]
        k = qkv[:, E:2 * E]
        v = qkv[:, 2 * E:]
    else:
        kv_src = kv_ref[0].astype(jnp.float32)  # (S, E) encoder output
        q = jnp.dot(y, wqkv[:, :E],
                    preferred_element_type=jnp.float32) + bqkv[:, :E]
        kv = jnp.dot(kv_src, wqkv[:, E:],
                     preferred_element_type=jnp.float32) + bqkv[:, E:]
        k = kv[:, :E]
        v = kv[:, E:]

    # scale q (L, Dh-wide slices) before the score matmul
    q = q * scale

    # combined additive mask built in-kernel: (L, S) + (1, S) -> (L, S)
    mask = mask_ref[...].astype(jnp.float32) + pad_ref[0].astype(jnp.float32)

    # per-head attention; heads are static lane slices of E (no transposes)
    heads = []
    for h in range(nhead):
        sl = slice(h * Dh, (h + 1) * Dh)
        s = jax.lax.dot_general(
            q[:, sl], k[:, sl],
            dimension_numbers=(((1,), (1,)), ((), ())),
            preferred_element_type=jnp.float32)          # (L, S)
        s = s + mask
        s = s - jnp.max(s, axis=-1, keepdims=True)
        p = jnp.exp(s)
        p = p * pl.reciprocal(jnp.sum(p, axis=-1, keepdims=True), approx=True)
        heads.append(jnp.dot(p, v[:, sl],
                             preferred_element_type=jnp.float32))  # (L, Dh)
    attn = jnp.concatenate(heads, axis=-1)               # (L, E), lane-dense

    # fused output projection + residual + (post-)LayerNorm
    attn = jnp.dot(attn, wo_ref[...],
                   preferred_element_type=jnp.float32) + bo_ref[...]
    out = (x + attn) if pre_norm else _ln(x + attn, gamma, beta, eps)
    o_ref[0] = out.astype(o_ref.dtype)


def attn_block(x, kv, p, gamma, beta, attn_mask, pad_bias, *,
               nhead, pre_norm, self_attn, eps=1e-5):
    """Fused attention sub-block.  x: (B, L, E); kv: (B, S, E) or None."""
    B, L, E = x.shape
    S = L if self_attn else kv.shape[1]
    scale = 1.0 / math.sqrt(E // nhead)

    wqkv = p["wqkv"]                     # (E, 3E)
    bqkv = p["bqkv"].reshape(1, 3 * E)
    wo = p["wo"]                         # (E, E)
    bo = p["bo"].reshape(1, E)

    inputs = [x]
    in_specs = [pl.BlockSpec((1, L, E), lambda b: (b, 0, 0))]
    if not self_attn:
        inputs.append(kv)
        in_specs.append(pl.BlockSpec((1, S, E), lambda b: (b, 0, 0)))
    inputs += [wqkv, bqkv, wo, bo, gamma.reshape(1, E), beta.reshape(1, E),
               attn_mask, pad_bias]
    in_specs += [
        pl.BlockSpec((E, 3 * E), lambda b: (0, 0)),
        pl.BlockSpec((1, 3 * E), lambda b: (0, 0)),
        pl.BlockSpec((E, E), lambda b: (0, 0)),
        pl.BlockSpec((1, E), lambda b: (0, 0)),
        pl.BlockSpec((1, E), lambda b: (0, 0)),
        pl.BlockSpec((1, E), lambda b: (0, 0)),
        pl.BlockSpec((L, S), lambda b: (0, 0)),
        pl.BlockSpec((1, 1, S), lambda b: (b, 0, 0)),
    ]

    kernel = functools.partial(_attn_block_kernel, nhead=nhead, scale=scale,
                               eps=eps, pre_norm=pre_norm, self_attn=self_attn)
    return pl.pallas_call(
        kernel,
        out_shape=jax.ShapeDtypeStruct((B, L, E), x.dtype),
        grid=(B,),
        in_specs=in_specs,
        out_specs=pl.BlockSpec((1, L, E), lambda b: (b, 0, 0)),
        input_output_aliases={0: 0},     # residual x updated in place
        compiler_params=pltpu.CompilerParams(
            dimension_semantics=("parallel",),
            vmem_limit_bytes=_VMEM_LIMIT),
    )(*inputs)


# --------------------------------------------------------------------------
# Fused FFN sub-block kernel:
#   (optional pre-LN) -> ff1 -> relu -> ff2 -> residual -> (post-LN)
# Hidden activation never leaves VMEM.  Grid tiles the flattened row axis.
# --------------------------------------------------------------------------

def _ffn_block_kernel(x_ref, w1_ref, b1_ref, w2_ref, b2_ref, g_ref, b_ref,
                      o_ref, *, eps, pre_norm):
    x = x_ref[...].astype(jnp.float32)          # (tm, E)
    gamma = g_ref[...].astype(jnp.float32)
    beta = b_ref[...].astype(jnp.float32)

    y = _ln(x, gamma, beta, eps) if pre_norm else x
    h = jnp.dot(y, w1_ref[...], preferred_element_type=jnp.float32) + b1_ref[...]
    h = jnp.maximum(h, 0.0)
    f = jnp.dot(h, w2_ref[...], preferred_element_type=jnp.float32) + b2_ref[...]
    out = (x + f) if pre_norm else _ln(x + f, gamma, beta, eps)
    o_ref[...] = out.astype(o_ref.dtype)


def _choose_row_tile(m, target=256):
    if m <= target:
        return m
    for t in range(target, 7, -1):
        if m % t == 0 and t % 8 == 0:
            return t
    return m


def ffn_block(x2d, w1, b1, w2, b2, gamma, beta, *, pre_norm, eps=1e-5):
    M, E = x2d.shape
    Fdim = w1.shape[1]
    tm = _choose_row_tile(M)
    kernel = functools.partial(_ffn_block_kernel, eps=eps, pre_norm=pre_norm)
    return pl.pallas_call(
        kernel,
        out_shape=jax.ShapeDtypeStruct((M, E), x2d.dtype),
        grid=(M // tm,),
        in_specs=[
            pl.BlockSpec((tm, E), lambda i: (i, 0)),
            pl.BlockSpec((E, Fdim), lambda i: (0, 0)),
            pl.BlockSpec((1, Fdim), lambda i: (0, 0)),
            pl.BlockSpec((Fdim, E), lambda i: (0, 0)),
            pl.BlockSpec((1, E), lambda i: (0, 0)),
            pl.BlockSpec((1, E), lambda i: (0, 0)),
            pl.BlockSpec((1, E), lambda i: (0, 0)),
        ],
        out_specs=pl.BlockSpec((tm, E), lambda i: (i, 0)),
        input_output_aliases={0: 0},
        compiler_params=pltpu.CompilerParams(
            dimension_semantics=("parallel",),
            vmem_limit_bytes=_VMEM_LIMIT),
    )(x2d, w1, b1.reshape(1, Fdim), w2, b2.reshape(1, E),
      gamma.reshape(1, E), beta.reshape(1, E))


# --------------------------------------------------------------------------
# Decoder block forward (3 fused pallas_calls)
# --------------------------------------------------------------------------

def decoder_block_forward(params, x, encoder_out, attn_mask, padding_mask,
                          nhead, pre_norm=False):
    B, L, E = x.shape

    # Tiny (B, 1, S) additive key-padding bias; the full (B, L, S) combined
    # mask is formed inside the attention kernels (never lands in HBM).
    pad_bias = jnp.where(padding_mask[:, None, :], _NEG_BIG, 0.0
                         ).astype(jnp.float32)
    attn_mask = attn_mask.astype(jnp.float32)

    g1, b1 = params["ln1"]
    g2, b2 = params["ln2"]
    g3, b3 = params["ln3"]

    # self-attention + out-proj + residual (+ LN1 when post-norm)
    x = attn_block(x, None, params["self"], g1, b1, attn_mask, pad_bias,
                   nhead=nhead, pre_norm=pre_norm, self_attn=True)

    # cross-attention + out-proj + residual (+ LN2).  As in the PyTorch code,
    # the same attn_mask / padding_mask are reused (requires S_enc == L).
    x = attn_block(x, encoder_out, params["cross"], g2, b2, attn_mask,
                   pad_bias, nhead=nhead, pre_norm=pre_norm, self_attn=False)

    # ff1 + relu + ff2 + residual (+ LN3); dropout1/dropout2 are identity.
    w1, bb1 = params["ff1"]
    w2, bb2 = params["ff2"]
    x = ffn_block(x.reshape(B * L, E), w1, bb1, w2, bb2, g3, b3,
                  pre_norm=pre_norm).reshape(B, L, E)
    return x


# --------------------------------------------------------------------------
# Deterministic parameter init (shapes follow the PyTorch module __init__,
# with Q/K/V packed into one (E, 3E) weight per attention block).
# --------------------------------------------------------------------------

def init_params(key, ndim, nhead, ndim_ff):
    ks = iter(jax.random.split(key, 16))

    def w(shape):
        return jax.random.normal(next(ks), shape, jnp.float32) * 0.02

    def attn_params():
        return {
            "wqkv": w((ndim, 3 * ndim)),   # packed [Wq | Wk | Wv], (in, out)
            "bqkv": w((3 * ndim,)),
            "wo": w((ndim, ndim)),
            "bo": w((ndim,)),
        }

    return {
        "self": attn_params(),
        "cross": attn_params(),
        "ln1": (jnp.ones((ndim,), jnp.float32), jnp.zeros((ndim,), jnp.float32)),
        "ln2": (jnp.ones((ndim,), jnp.float32), jnp.zeros((ndim,), jnp.float32)),
        "ln3": (jnp.ones((ndim,), jnp.float32), jnp.zeros((ndim,), jnp.float32)),
        "ff1": (w((ndim, ndim_ff)), w((ndim_ff,))),
        "ff2": (w((ndim_ff, ndim)), w((ndim,))),
    }


# --------------------------------------------------------------------------

if __name__ == "__main__":
    # Small, module-consistent shapes: nhead=4, ndim=32, ff=64, B=2, seq=8.
    nhead, ndim, ndim_ff = 4, 32, 64
    B, L = 2, 8

    key = jax.random.PRNGKey(0)
    kx, ke, kp = jax.random.split(key, 3)
    x = jax.random.normal(kx, (B, L, ndim), jnp.float32)
    encoder_out = jax.random.normal(ke, (B, L, ndim), jnp.float32)

    # Float additive causal attn_mask (L, L) and boolean key_padding_mask (B, L)
    attn_mask = jnp.where(jnp.triu(jnp.ones((L, L), bool), k=1),
                          _NEG_BIG, 0.0).astype(jnp.float32)
    padding_mask = jnp.zeros((B, L), bool).at[1, L - 1].set(True)

    params = init_params(kp, ndim, nhead, ndim_ff)

    fwd = jax.jit(functools.partial(decoder_block_forward,
                                    nhead=nhead, pre_norm=False))
    out = fwd(params, x, encoder_out, attn_mask, padding_mask)
    out = jax.block_until_ready(out)

    assert out.shape == (B, L, ndim), out.shape
    assert bool(jnp.all(jnp.isfinite(out)))
    print("KERNEL_OK")
</pallas_src>

<mosaic_0001>
module attributes {stable_mosaic.version = 11 : i64} {
  func.func @_attn_block_kernel(%arg0: i32, %arg1: memref<1x8x32xf32, #tpu.memory_space<vmem>>, %arg2: memref<32x96xf32, #tpu.memory_space<vmem>>, %arg3: memref<1x96xf32, #tpu.memory_space<vmem>>, %arg4: memref<32x32xf32, #tpu.memory_space<vmem>>, %arg5: memref<1x32xf32, #tpu.memory_space<vmem>>, %arg6: memref<1x32xf32, #tpu.memory_space<vmem>>, %arg7: memref<1x32xf32, #tpu.memory_space<vmem>>, %arg8: memref<8x8xf32, #tpu.memory_space<vmem>>, %arg9: memref<1x1x8xf32, #tpu.memory_space<vmem>>, %arg10: memref<1x8x32xf32, #tpu.memory_space<vmem>>) attributes {dimension_semantics = [#tpu.dimension_semantics<parallel>], iteration_bounds = array<i64: 2>, scalar_prefetch = 0 : i64, scratch_operands = 0 : i64, tpu.core_type = #tpu.core_type<tc>, window_params = [{transform_indices = @transform_0, window_bounds = array<i64: 1, 8, 32>}, {pipeline_mode = #tpu.pipeline_mode<synchronous>, transform_indices = @transform_1, window_bounds = array<i64: 32, 96>}, {pipeline_mode = #tpu.pipeline_mode<synchronous>, transform_indices = @transform_2, window_bounds = array<i64: 1, 96>}, {pipeline_mode = #tpu.pipeline_mode<synchronous>, transform_indices = @transform_3, window_bounds = array<i64: 32, 32>}, {pipeline_mode = #tpu.pipeline_mode<synchronous>, transform_indices = @transform_4, window_bounds = array<i64: 1, 32>}, {pipeline_mode = #tpu.pipeline_mode<synchronous>, transform_indices = @transform_5, window_bounds = array<i64: 1, 32>}, {pipeline_mode = #tpu.pipeline_mode<synchronous>, transform_indices = @transform_6, window_bounds = array<i64: 1, 32>}, {pipeline_mode = #tpu.pipeline_mode<synchronous>, transform_indices = @transform_7, window_bounds = array<i64: 8, 8>}, {transform_indices = @transform_8, window_bounds = array<i64: 1, 1, 8>}, {transform_indices = @transform_9, window_bounds = array<i64: 1, 8, 32>}]} {
    %c0 = arith.constant 0 : index
    %c0_0 = arith.constant 0 : index
    %c0_1 = arith.constant 0 : index
    %0 = vector.load %arg1[%c0, %c0_0, %c0_1] : memref<1x8x32xf32, #tpu.memory_space<vmem>>, vector<1x8x32xf32>
    %1 = vector.shape_cast %0 : vector<1x8x32xf32> to vector<8x32xf32>
    %c0_2 = arith.constant 0 : index
    %c0_3 = arith.constant 0 : index
    %2 = vector.load %arg6[%c0_2, %c0_3] : memref<1x32xf32, #tpu.memory_space<vmem>>, vector<1x32xf32>
    %c0_4 = arith.constant 0 : index
    %c0_5 = arith.constant 0 : index
    %3 = vector.load %arg7[%c0_4, %c0_5] : memref<1x32xf32, #tpu.memory_space<vmem>>, vector<1x32xf32>
    %c0_6 = arith.constant 0 : index
    %c0_7 = arith.constant 0 : index
    %4 = vector.load %arg2[%c0_6, %c0_7] : memref<32x96xf32, #tpu.memory_space<vmem>>, vector<32x96xf32>
    %c0_8 = arith.constant 0 : index
    %c0_9 = arith.constant 0 : index
    %5 = vector.load %arg3[%c0_8, %c0_9] : memref<1x96xf32, #tpu.memory_space<vmem>>, vector<1x96xf32>
    %cst = arith.constant dense<0.000000e+00> : vector<8x96xf32>
    %6 = tpu.matmul %1, %4, %cst {dimension_numbers = #tpu.dot_dimension_numbers<[1], [0], [0], [1], [0, 0, 1, 1], [], []>} : vector<8x32xf32>, vector<32x96xf32>, vector<8x96xf32> -> vector<8x96xf32>
    %7 = vector.broadcast %5 : vector<1x96xf32> to vector<8x96xf32>
    %8 = arith.addf %6, %7 : vector<8x96xf32>
    %9 = vector.extract_strided_slice %8 {offsets = [0, 0], sizes = [8, 32], strides = [1, 1]} : vector<8x96xf32> to vector<8x32xf32>
    %10 = vector.extract_strided_slice %8 {offsets = [0, 32], sizes = [8, 32], strides = [1, 1]} : vector<8x96xf32> to vector<8x32xf32>
    %11 = vector.extract_strided_slice %8 {offsets = [0, 64], sizes = [8, 32], strides = [1, 1]} : vector<8x96xf32> to vector<8x32xf32>
    %cst_10 = arith.constant 0.353553385 : f32
    %12 = vector.broadcast %cst_10 : f32 to vector<8x32xf32>
    %13 = arith.mulf %9, %12 : vector<8x32xf32>
    %c0_11 = arith.constant 0 : index
    %c0_12 = arith.constant 0 : index
    %14 = vector.load %arg8[%c0_11, %c0_12] : memref<8x8xf32, #tpu.memory_space<vmem>>, vector<8x8xf32>
    %c0_13 = arith.constant 0 : index
    %c0_14 = arith.constant 0 : index
    %c0_15 = arith.constant 0 : index
    %15 = vector.load %arg9[%c0_13, %c0_14, %c0_15] : memref<1x1x8xf32, #tpu.memory_space<vmem>>, vector<1x1x8xf32>
    %16 = vector.shape_cast %15 : vector<1x1x8xf32> to vector<1x8xf32>
    %17 = vector.broadcast %16 : vector<1x8xf32> to vector<8x8xf32>
    %18 = arith.addf %14, %17 : vector<8x8xf32>
    %19 = vector.extract_strided_slice %13 {offsets = [0, 0], sizes = [8, 8], strides = [1, 1]} : vector<8x32xf32> to vector<8x8xf32>
    %20 = vector.extract_strided_slice %10 {offsets = [0, 0], sizes = [8, 8], strides = [1, 1]} : vector<8x32xf32> to vector<8x8xf32>
    %cst_16 = arith.constant dense<0.000000e+00> : vector<8x8xf32>
    %21 = tpu.matmul %19, %20, %cst_16 {dimension_numbers = #tpu.dot_dimension_numbers<[1], [1], [0], [0], [0, 0, 1, 0], [], []>} : vector<8x8xf32>, vector<8x8xf32>, vector<8x8xf32> -> vector<8x8xf32>
    %22 = arith.addf %21, %18 : vector<8x8xf32>
    %cst_17 = arith.constant dense<0xFF800000> : vector<8xf32>
    %23 = vector.multi_reduction <maximumf>, %22, %cst_17 [1] : vector<8x8xf32> to vector<8xf32>
    %24 = vector.shape_cast %23 : vector<8xf32> to vector<8x1xf32>
    %25 = vector.broadcast %24 : vector<8x1xf32> to vector<8x8xf32>
    %26 = arith.subf %22, %25 : vector<8x8xf32>
    %27 = math.exp %26 : vector<8x8xf32>
    %cst_18 = arith.constant dense<0.000000e+00> : vector<8xf32>
    %28 = vector.multi_reduction <add>, %27, %cst_18 [1] : vector<8x8xf32> to vector<8xf32>
    %29 = vector.shape_cast %28 : vector<8xf32> to vector<8x1xf32>
    %30 = tpu.reciprocal %29 {approx = true} : vector<8x1xf32> -> vector<8x1xf32>
    %31 = vector.broadcast %30 : vector<8x1xf32> to vector<8x8xf32>
    %32 = arith.mulf %27, %31 : vector<8x8xf32>
    %33 = vector.extract_strided_slice %11 {offsets = [0, 0], sizes = [8, 8], strides = [1, 1]} : vector<8x32xf32> to vector<8x8xf32>
    %cst_19 = arith.constant dense<0.000000e+00> : vector<8x8xf32>
    %34 = tpu.matmul %32, %33, %cst_19 {dimension_numbers = #tpu.dot_dimension_numbers<[1], [0], [0], [1], [0, 0, 1, 1], [], []>} : vector<8x8xf32>, vector<8x8xf32>, vector<8x8xf32> -> vector<8x8xf32>
    %35 = vector.extract_strided_slice %13 {offsets = [0, 8], sizes = [8, 8], strides = [1, 1]} : vector<8x32xf32> to vector<8x8xf32>
    %36 = vector.extract_strided_slice %10 {offsets = [0, 8], sizes = [8, 8], strides = [1, 1]} : vector<8x32xf32> to vector<8x8xf32>
    %cst_20 = arith.constant dense<0.000000e+00> : vector<8x8xf32>
    %37 = tpu.matmul %35, %36, %cst_20 {dimension_numbers = #tpu.dot_dimension_numbers<[1], [1], [0], [0], [0, 0, 1, 0], [], []>} : vector<8x8xf32>, vector<8x8xf32>, vector<8x8xf32> -> vector<8x8xf32>
    %38 = arith.addf %37, %18 : vector<8x8xf32>
    %cst_21 = arith.constant dense<0xFF800000> : vector<8xf32>
    %39 = vector.multi_reduction <maximumf>, %38, %cst_21 [1] : vector<8x8xf32> to vector<8xf32>
    %40 = vector.shape_cast %39 : vector<8xf32> to vector<8x1xf32>
    %41 = vector.broadcast %40 : vector<8x1xf32> to vector<8x8xf32>
    %42 = arith.subf %38, %41 : vector<8x8xf32>
    %43 = math.exp %42 : vector<8x8xf32>
    %cst_22 = arith.constant dense<0.000000e+00> : vector<8xf32>
    %44 = vector.multi_reduction <add>, %43, %cst_22 [1] : vector<8x8xf32> to vector<8xf32>
    %45 = vector.shape_cast %44 : vector<8xf32> to vector<8x1xf32>
    %46 = tpu.reciprocal %45 {approx = true} : vector<8x1xf32> -> vector<8x1xf32>
    %47 = vector.broadcast %46 : vector<8x1xf32> to vector<8x8xf32>
    %48 = arith.mulf %43, %47 : vector<8x8xf32>
    %49 = vector.extract_strided_slice %11 {offsets = [0, 8], sizes = [8, 8], strides = [1, 1]} : vector<8x32xf32> to vector<8x8xf32>
    %cst_23 = arith.constant dense<0.000000e+00> : vector<8x8xf32>
    %50 = tpu.matmul %48, %49, %cst_23 {dimension_numbers = #tpu.dot_dimension_numbers<[1], [0], [0], [1], [0, 0, 1, 1], [], []>} : vector<8x8xf32>, vector<8x8xf32>, vector<8x8xf32> -> vector<8x8xf32>
    %51 = vector.extract_strided_slice %13 {offsets = [0, 16], sizes = [8, 8], strides = [1, 1]} : vector<8x32xf32> to vector<8x8xf32>
    %52 = vector.extract_strided_slice %10 {offsets = [0, 16], sizes = [8, 8], strides = [1, 1]} : vector<8x32xf32> to vector<8x8xf32>
    %cst_24 = arith.constant dense<0.000000e+00> : vector<8x8xf32>
    %53 = tpu.matmul %51, %52, %cst_24 {dimension_numbers = #tpu.dot_dimension_numbers<[1], [1], [0], [0], [0, 0, 1, 0], [], []>} : vector<8x8xf32>, vector<8x8xf32>, vector<8x8xf32> -> vector<8x8xf32>
    %54 = arith.addf %53, %18 : vector<8x8xf32>
    %cst_25 = arith.constant dense<0xFF800000> : vector<8xf32>
    %55 = vector.multi_reduction <maximumf>, %54, %cst_25 [1] : vector<8x8xf32> to vector<8xf32>
    %56 = vector.shape_cast %55 : vector<8xf32> to vector<8x1xf32>
    %57 = vector.broadcast %56 : vector<8x1xf32> to vector<8x8xf32>
    %58 = arith.subf %54, %57 : vector<8x8xf32>
    %59 = math.exp %58 : vector<8x8xf32>
    %cst_26 = arith.constant dense<0.000000e+00> : vector<8xf32>
    %60 = vector.multi_reduction <add>, %59, %cst_26 [1] : vector<8x8xf32> to vector<8xf32>
    %61 = vector.shape_cast %60 : vector<8xf32> to vector<8x1xf32>
    %62 = tpu.reciprocal %61 {approx = true} : vector<8x1xf32> -> vector<8x1xf32>
    %63 = vector.broadcast %62 : vector<8x1xf32> to vector<8x8xf32>
    %64 = arith.mulf %59, %63 : vector<8x8xf32>
    %65 = vector.extract_strided_slice %11 {offsets = [0, 16], sizes = [8, 8], strides = [1, 1]} : vector<8x32xf32> to vector<8x8xf32>
    %cst_27 = arith.constant dense<0.000000e+00> : vector<8x8xf32>
    %66 = tpu.matmul %64, %65, %cst_27 {dimension_numbers = #tpu.dot_dimension_numbers<[1], [0], [0], [1], [0, 0, 1, 1], [], []>} : vector<8x8xf32>, vector<8x8xf32>, vector<8x8xf32> -> vector<8x8xf32>
    %67 = vector.extract_strided_slice %13 {offsets = [0, 24], sizes = [8, 8], strides = [1, 1]} : vector<8x32xf32> to vector<8x8xf32>
    %68 = vector.extract_strided_slice %10 {offsets = [0, 24], sizes = [8, 8], strides = [1, 1]} : vector<8x32xf32> to vector<8x8xf32>
    %cst_28 = arith.constant dense<0.000000e+00> : vector<8x8xf32>
    %69 = tpu.matmul %67, %68, %cst_28 {dimension_numbers = #tpu.dot_dimension_numbers<[1], [1], [0], [0], [0, 0, 1, 0], [], []>} : vector<8x8xf32>, vector<8x8xf32>, vector<8x8xf32> -> vector<8x8xf32>
    %70 = arith.addf %69, %18 : vector<8x8xf32>
    %cst_29 = arith.constant dense<0xFF800000> : vector<8xf32>
    %71 = vector.multi_reduction <maximumf>, %70, %cst_29 [1] : vector<8x8xf32> to vector<8xf32>
    %72 = vector.shape_cast %71 : vector<8xf32> to vector<8x1xf32>
    %73 = vector.broadcast %72 : vector<8x1xf32> to vector<8x8xf32>
    %74 = arith.subf %70, %73 : vector<8x8xf32>
    %75 = math.exp %74 : vector<8x8xf32>
    %cst_30 = arith.constant dense<0.000000e+00> : vector<8xf32>
    %76 = vector.multi_reduction <add>, %75, %cst_30 [1] : vector<8x8xf32> to vector<8xf32>
    %77 = vector.shape_cast %76 : vector<8xf32> to vector<8x1xf32>
    %78 = tpu.reciprocal %77 {approx = true} : vector<8x1xf32> -> vector<8x1xf32>
    %79 = vector.broadcast %78 : vector<8x1xf32> to vector<8x8xf32>
    %80 = arith.mulf %75, %79 : vector<8x8xf32>
    %81 = vector.extract_strided_slice %11 {offsets = [0, 24], sizes = [8, 8], strides = [1, 1]} : vector<8x32xf32> to vector<8x8xf32>
    %cst_31 = arith.constant dense<0.000000e+00> : vector<8x8xf32>
    %82 = tpu.matmul %80, %81, %cst_31 {dimension_numbers = #tpu.dot_dimension_numbers<[1], [0], [0], [1], [0, 0, 1, 1], [], []>} : vector<8x8xf32>, vector<8x8xf32>, vector<8x8xf32> -> vector<8x8xf32>
    %83 = tpu.concatenate %34, %50, %66, %82 in 1 : vector<8x8xf32>, vector<8x8xf32>, vector<8x8xf32>, vector<8x8xf32> -> vector<8x32xf32>
    %c0_32 = arith.constant 0 : index
    %c0_33 = arith.constant 0 : index
    %84 = vector.load %arg4[%c0_32, %c0_33] : memref<32x32xf32, #tpu.memory_space<vmem>>, vector<32x32xf32>
    %cst_34 = arith.constant dense<0.000000e+00> : vector<8x32xf32>
    %85 = tpu.matmul %83, %84, %cst_34 {dimension_numbers = #tpu.dot_dimension_numbers<[1], [0], [0], [1], [0, 0, 1, 1], [], []>} : vector<8x32xf32>, vector<32x32xf32>, vector<8x32xf32> -> vector<8x32xf32>
    %c0_35 = arith.constant 0 : index
    %c0_36 = arith.constant 0 : index
    %86 = vector.load %arg5[%c0_35, %c0_36] : memref<1x32xf32, #tpu.memory_space<vmem>>, vector<1x32xf32>
    %87 = vector.broadcast %86 : vector<1x32xf32> to vector<8x32xf32>
    %88 = arith.addf %85, %87 : vector<8x32xf32>
    %89 = arith.addf %1, %88 : vector<8x32xf32>
    %cst_37 = arith.constant dense<0.000000e+00> : vector<8xf32>
    %90 = vector.multi_reduction <add>, %89, %cst_37 [1] : vector<8x32xf32> to vector<8xf32>
    %91 = vector.shape_cast %90 : vector<8xf32> to vector<8x1xf32>
    %cst_38 = arith.constant 3.200000e+01 : f32
    %92 = vector.broadcast %cst_38 : f32 to vector<8x1xf32>
    %93 = arith.divf %91, %92 : vector<8x1xf32>
    %94 = vector.broadcast %93 : vector<8x1xf32> to vector<8x32xf32>
    %95 = arith.subf %89, %94 : vector<8x32xf32>
    %96 = arith.mulf %95, %95 : vector<8x32xf32>
    %cst_39 = arith.constant dense<0.000000e+00> : vector<8xf32>
    %97 = vector.multi_reduction <add>, %96, %cst_39 [1] : vector<8x32xf32> to vector<8xf32>
    %98 = vector.shape_cast %97 : vector<8xf32> to vector<8x1xf32>
    %cst_40 = arith.constant 3.200000e+01 : f32
    %99 = vector.broadcast %cst_40 : f32 to vector<8x1xf32>
    %100 = arith.divf %98, %99 : vector<8x1xf32>
    %101 = vector.broadcast %93 : vector<8x1xf32> to vector<8x32xf32>
    %102 = arith.subf %89, %101 : vector<8x32xf32>
    %cst_41 = arith.constant 9.99999974E-6 : f32
    %103 = vector.broadcast %cst_41 : f32 to vector<8x1xf32>
    %104 = arith.addf %100, %103 : vector<8x1xf32>
    %105 = math.rsqrt %104 : vector<8x1xf32>
    %106 = vector.broadcast %105 : vector<8x1xf32> to vector<8x32xf32>
    %107 = arith.mulf %102, %106 : vector<8x32xf32>
    %108 = vector.broadcast %2 : vector<1x32xf32> to vector<8x32xf32>
    %109 = arith.mulf %107, %108 : vector<8x32xf32>
    %110 = vector.broadcast %3 : vector<1x32xf32> to vector<8x32xf32>
    %111 = arith.addf %109, %110 : vector<8x32xf32>
    %c0_42 = arith.constant 0 : index
    %c0_43 = arith.constant 0 : index
    %c0_44 = arith.constant 0 : index
    %112 = vector.load %arg10[%c0_42, %c0_43, %c0_44] : memref<1x8x32xf32, #tpu.memory_space<vmem>>, vector<1x8x32xf32>
    %113 = vector.shape_cast %112 : vector<1x8x32xf32> to vector<8x32xf32>
    %114 = vector.shape_cast %111 : vector<8x32xf32> to vector<1x8x32xf32>
    tpu.vector_store %arg10[%c0_42, %c0_43, %c0_44], %114 {strides = array<i32>} : memref<1x8x32xf32, #tpu.memory_space<vmem>>, vector<1x8x32xf32>,
    return
  }
  func.func @transform_0(%arg0: i32) -> (i32, i32, i32) {
    %c0_i32 = arith.constant 0 : i32
    %c0_i32_0 = arith.constant 0 : i32
    %c0_i32_1 = arith.constant 0 : i32
    return %arg0, %c0_i32, %c0_i32_0 : i32, i32, i32
  }
  func.func @transform_1(%arg0: i32) -> (i32, i32) {
    %c0_i32 = arith.constant 0 : i32
    %c0_i32_0 = arith.constant 0 : i32
    %c0_i32_1 = arith.constant 0 : i32
    return %c0_i32, %c0_i32_0 : i32, i32
  }
  func.func @transform_2(%arg0: i32) -> (i32, i32) {
    %c0_i32 = arith.constant 0 : i32
    %c0_i32_0 = arith.constant 0 : i32
    %c0_i32_1 = arith.constant 0 : i32
    return %c0_i32, %c0_i32_0 : i32, i32
  }
  func.func @transform_3(%arg0: i32) -> (i32, i32) {
    %c0_i32 = arith.constant 0 : i32
    %c0_i32_0 = arith.constant 0 : i32
    %c0_i32_1 = arith.constant 0 : i32
    return %c0_i32, %c0_i32_0 : i32, i32
  }
  func.func @transform_4(%arg0: i32) -> (i32, i32) {
    %c0_i32 = arith.constant 0 : i32
    %c0_i32_0 = arith.constant 0 : i32
    %c0_i32_1 = arith.constant 0 : i32
    return %c0_i32, %c0_i32_0 : i32, i32
  }
  func.func @transform_5(%arg0: i32) -> (i32, i32) {
    %c0_i32 = arith.constant 0 : i32
    %c0_i32_0 = arith.constant 0 : i32
    %c0_i32_1 = arith.constant 0 : i32
    return %c0_i32, %c0_i32_0 : i32, i32
  }
  func.func @transform_6(%arg0: i32) -> (i32, i32) {
    %c0_i32 = arith.constant 0 : i32
    %c0_i32_0 = arith.constant 0 : i32
    %c0_i32_1 = arith.constant 0 : i32
    return %c0_i32, %c0_i32_0 : i32, i32
  }
  func.func @transform_7(%arg0: i32) -> (i32, i32) {
    %c0_i32 = arith.constant 0 : i32
    %c0_i32_0 = arith.constant 0 : i32
    %c0_i32_1 = arith.constant 0 : i32
    return %c0_i32, %c0_i32_0 : i32, i32
  }
  func.func @transform_8(%arg0: i32) -> (i32, i32, i32) {
    %c0_i32 = arith.constant 0 : i32
    %c0_i32_0 = arith.constant 0 : i32
    %c0_i32_1 = arith.constant 0 : i32
    return %arg0, %c0_i32, %c0_i32_0 : i32, i32, i32
  }
  func.func @transform_9(%arg0: i32) -> (i32, i32, i32) {
    %c0_i32 = arith.constant 0 : i32
    %c0_i32_0 = arith.constant 0 : i32
    %c0_i32_1 = arith.constant 0 : i32
    return %arg0, %c0_i32, %c0_i32_0 : i32, i32, i32
  }
}

module attributes {stable_mosaic.version = 11 : i64} {
  func.func @_attn_block_kernel(%arg0: i32, %arg1: memref<1x8x32xf32, #tpu.memory_space<vmem>>, %arg2: memref<1x8x32xf32, #tpu.memory_space<vmem>>, %arg3: memref<32x96xf32, #tpu.memory_space<vmem>>, %arg4: memref<1x96xf32, #tpu.memory_space<vmem>>, %arg5: memref<32x32xf32, #tpu.memory_space<vmem>>, %arg6: memref<1x32xf32, #tpu.memory_space<vmem>>, %arg7: memref<1x32xf32, #tpu.memory_space<vmem>>, %arg8: memref<1x32xf32, #tpu.memory_space<vmem>>, %arg9: memref<8x8xf32, #tpu.memory_space<vmem>>, %arg10: memref<1x1x8xf32, #tpu.memory_space<vmem>>, %arg11: memref<1x8x32xf32, #tpu.memory_space<vmem>>) attributes {dimension_semantics = [#tpu.dimension_semantics<parallel>], iteration_bounds = array<i64: 2>, scalar_prefetch = 0 : i64, scratch_operands = 0 : i64, tpu.core_type = #tpu.core_type<tc>, window_params = [{transform_indices = @transform_0, window_bounds = array<i64: 1, 8, 32>}, {transform_indices = @transform_1, window_bounds = array<i64: 1, 8, 32>}, {pipeline_mode = #tpu.pipeline_mode<synchronous>, transform_indices = @transform_2, window_bounds = array<i64: 32, 96>}, {pipeline_mode = #tpu.pipeline_mode<synchronous>, transform_indices = @transform_3, window_bounds = array<i64: 1, 96>}, {pipeline_mode = #tpu.pipeline_mode<synchronous>, transform_indices = @transform_4, window_bounds = array<i64: 32, 32>}, {pipeline_mode = #tpu.pipeline_mode<synchronous>, transform_indices = @transform_5, window_bounds = array<i64: 1, 32>}, {pipeline_mode = #tpu.pipeline_mode<synchronous>, transform_indices = @transform_6, window_bounds = array<i64: 1, 32>}, {pipeline_mode = #tpu.pipeline_mode<synchronous>, transform_indices = @transform_7, window_bounds = array<i64: 1, 32>}, {pipeline_mode = #tpu.pipeline_mode<synchronous>, transform_indices = @transform_8, window_bounds = array<i64: 8, 8>}, {transform_indices = @transform_9, window_bounds = array<i64: 1, 1, 8>}, {transform_indices = @transform_10, window_bounds = array<i64: 1, 8, 32>}]} {
    %c0 = arith.constant 0 : index
    %c0_0 = arith.constant 0 : index
    %c0_1 = arith.constant 0 : index
    %0 = vector.load %arg1[%c0, %c0_0, %c0_1] : memref<1x8x32xf32, #tpu.memory_space<vmem>>, vector<1x8x32xf32>
    %1 = vector.shape_cast %0 : vector<1x8x32xf32> to vector<8x32xf32>
    %c0_2 = arith.constant 0 : index
    %c0_3 = arith.constant 0 : index
    %2 = vector.load %arg7[%c0_2, %c0_3] : memref<1x32xf32, #tpu.memory_space<vmem>>, vector<1x32xf32>
    %c0_4 = arith.constant 0 : index
    %c0_5 = arith.constant 0 : index
    %3 = vector.load %arg8[%c0_4, %c0_5] : memref<1x32xf32, #tpu.memory_space<vmem>>, vector<1x32xf32>
    %c0_6 = arith.constant 0 : index
    %c0_7 = arith.constant 0 : index
    %4 = vector.load %arg3[%c0_6, %c0_7] : memref<32x96xf32, #tpu.memory_space<vmem>>, vector<32x96xf32>
    %c0_8 = arith.constant 0 : index
    %c0_9 = arith.constant 0 : index
    %5 = vector.load %arg4[%c0_8, %c0_9] : memref<1x96xf32, #tpu.memory_space<vmem>>, vector<1x96xf32>
    %c0_10 = arith.constant 0 : index
    %c0_11 = arith.constant 0 : index
    %c0_12 = arith.constant 0 : index
    %6 = vector.load %arg2[%c0_10, %c0_11, %c0_12] : memref<1x8x32xf32, #tpu.memory_space<vmem>>, vector<1x8x32xf32>
    %7 = vector.shape_cast %6 : vector<1x8x32xf32> to vector<8x32xf32>
    %8 = vector.extract_strided_slice %4 {offsets = [0, 0], sizes = [32, 32], strides = [1, 1]} : vector<32x96xf32> to vector<32x32xf32>
    %cst = arith.constant dense<0.000000e+00> : vector<8x32xf32>
    %9 = tpu.matmul %1, %8, %cst {dimension_numbers = #tpu.dot_dimension_numbers<[1], [0], [0], [1], [0, 0, 1, 1], [], []>} : vector<8x32xf32>, vector<32x32xf32>, vector<8x32xf32> -> vector<8x32xf32>
    %10 = vector.extract_strided_slice %5 {offsets = [0, 0], sizes = [1, 32], strides = [1, 1]} : vector<1x96xf32> to vector<1x32xf32>
    %11 = vector.broadcast %10 : vector<1x32xf32> to vector<8x32xf32>
    %12 = arith.addf %9, %11 : vector<8x32xf32>
    %13 = vector.extract_strided_slice %4 {offsets = [0, 32], sizes = [32, 64], strides = [1, 1]} : vector<32x96xf32> to vector<32x64xf32>
    %cst_13 = arith.constant dense<0.000000e+00> : vector<8x64xf32>
    %14 = tpu.matmul %7, %13, %cst_13 {dimension_numbers = #tpu.dot_dimension_numbers<[1], [0], [0], [1], [0, 0, 1, 1], [], []>} : vector<8x32xf32>, vector<32x64xf32>, vector<8x64xf32> -> vector<8x64xf32>
    %15 = vector.extract_strided_slice %5 {offsets = [0, 32], sizes = [1, 64], strides = [1, 1]} : vector<1x96xf32> to vector<1x64xf32>
    %16 = vector.broadcast %15 : vector<1x64xf32> to vector<8x64xf32>
    %17 = arith.addf %14, %16 : vector<8x64xf32>
    %18 = vector.extract_strided_slice %17 {offsets = [0, 0], sizes = [8, 32], strides = [1, 1]} : vector<8x64xf32> to vector<8x32xf32>
    %19 = vector.extract_strided_slice %17 {offsets = [0, 32], sizes = [8, 32], strides = [1, 1]} : vector<8x64xf32> to vector<8x32xf32>
    %cst_14 = arith.constant 0.353553385 : f32
    %20 = vector.broadcast %cst_14 : f32 to vector<8x32xf32>
    %21 = arith.mulf %12, %20 : vector<8x32xf32>
    %c0_15 = arith.constant 0 : index
    %c0_16 = arith.constant 0 : index
    %22 = vector.load %arg9[%c0_15, %c0_16] : memref<8x8xf32, #tpu.memory_space<vmem>>, vector<8x8xf32>
    %c0_17 = arith.constant 0 : index
    %c0_18 = arith.constant 0 : index
    %c0_19 = arith.constant 0 : index
    %23 = vector.load %arg10[%c0_17, %c0_18, %c0_19] : memref<1x1x8xf32, #tpu.memory_space<vmem>>, vector<1x1x8xf32>
    %24 = vector.shape_cast %23 : vector<1x1x8xf32> to vector<1x8xf32>
    %25 = vector.broadcast %24 : vector<1x8xf32> to vector<8x8xf32>
    %26 = arith.addf %22, %25 : vector<8x8xf32>
    %27 = vector.extract_strided_slice %21 {offsets = [0, 0], sizes = [8, 8], strides = [1, 1]} : vector<8x32xf32> to vector<8x8xf32>
    %28 = vector.extract_strided_slice %18 {offsets = [0, 0], sizes = [8, 8], strides = [1, 1]} : vector<8x32xf32> to vector<8x8xf32>
    %cst_20 = arith.constant dense<0.000000e+00> : vector<8x8xf32>
    %29 = tpu.matmul %27, %28, %cst_20 {dimension_numbers = #tpu.dot_dimension_numbers<[1], [1], [0], [0], [0, 0, 1, 0], [], []>} : vector<8x8xf32>, vector<8x8xf32>, vector<8x8xf32> -> vector<8x8xf32>
    %30 = arith.addf %29, %26 : vector<8x8xf32>
    %cst_21 = arith.constant dense<0xFF800000> : vector<8xf32>
    %31 = vector.multi_reduction <maximumf>, %30, %cst_21 [1] : vector<8x8xf32> to vector<8xf32>
    %32 = vector.shape_cast %31 : vector<8xf32> to vector<8x1xf32>
    %33 = vector.broadcast %32 : vector<8x1xf32> to vector<8x8xf32>
    %34 = arith.subf %30, %33 : vector<8x8xf32>
    %35 = math.exp %34 : vector<8x8xf32>
    %cst_22 = arith.constant dense<0.000000e+00> : vector<8xf32>
    %36 = vector.multi_reduction <add>, %35, %cst_22 [1] : vector<8x8xf32> to vector<8xf32>
    %37 = vector.shape_cast %36 : vector<8xf32> to vector<8x1xf32>
    %38 = tpu.reciprocal %37 {approx = true} : vector<8x1xf32> -> vector<8x1xf32>
    %39 = vector.broadcast %38 : vector<8x1xf32> to vector<8x8xf32>
    %40 = arith.mulf %35, %39 : vector<8x8xf32>
    %41 = vector.extract_strided_slice %19 {offsets = [0, 0], sizes = [8, 8], strides = [1, 1]} : vector<8x32xf32> to vector<8x8xf32>
    %cst_23 = arith.constant dense<0.000000e+00> : vector<8x8xf32>
    %42 = tpu.matmul %40, %41, %cst_23 {dimension_numbers = #tpu.dot_dimension_numbers<[1], [0], [0], [1], [0, 0, 1, 1], [], []>} : vector<8x8xf32>, vector<8x8xf32>, vector<8x8xf32> -> vector<8x8xf32>
    %43 = vector.extract_strided_slice %21 {offsets = [0, 8], sizes = [8, 8], strides = [1, 1]} : vector<8x32xf32> to vector<8x8xf32>
    %44 = vector.extract_strided_slice %18 {offsets = [0, 8], sizes = [8, 8], strides = [1, 1]} : vector<8x32xf32> to vector<8x8xf32>
    %cst_24 = arith.constant dense<0.000000e+00> : vector<8x8xf32>
    %45 = tpu.matmul %43, %44, %cst_24 {dimension_numbers = #tpu.dot_dimension_numbers<[1], [1], [0], [0], [0, 0, 1, 0], [], []>} : vector<8x8xf32>, vector<8x8xf32>, vector<8x8xf32> -> vector<8x8xf32>
    %46 = arith.addf %45, %26 : vector<8x8xf32>
    %cst_25 = arith.constant dense<0xFF800000> : vector<8xf32>
    %47 = vector.multi_reduction <maximumf>, %46, %cst_25 [1] : vector<8x8xf32> to vector<8xf32>
    %48 = vector.shape_cast %47 : vector<8xf32> to vector<8x1xf32>
    %49 = vector.broadcast %48 : vector<8x1xf32> to vector<8x8xf32>
    %50 = arith.subf %46, %49 : vector<8x8xf32>
    %51 = math.exp %50 : vector<8x8xf32>
    %cst_26 = arith.constant dense<0.000000e+00> : vector<8xf32>
    %52 = vector.multi_reduction <add>, %51, %cst_26 [1] : vector<8x8xf32> to vector<8xf32>
    %53 = vector.shape_cast %52 : vector<8xf32> to vector<8x1xf32>
    %54 = tpu.reciprocal %53 {approx = true} : vector<8x1xf32> -> vector<8x1xf32>
    %55 = vector.broadcast %54 : vector<8x1xf32> to vector<8x8xf32>
    %56 = arith.mulf %51, %55 : vector<8x8xf32>
    %57 = vector.extract_strided_slice %19 {offsets = [0, 8], sizes = [8, 8], strides = [1, 1]} : vector<8x32xf32> to vector<8x8xf32>
    %cst_27 = arith.constant dense<0.000000e+00> : vector<8x8xf32>
    %58 = tpu.matmul %56, %57, %cst_27 {dimension_numbers = #tpu.dot_dimension_numbers<[1], [0], [0], [1], [0, 0, 1, 1], [], []>} : vector<8x8xf32>, vector<8x8xf32>, vector<8x8xf32> -> vector<8x8xf32>
    %59 = vector.extract_strided_slice %21 {offsets = [0, 16], sizes = [8, 8], strides = [1, 1]} : vector<8x32xf32> to vector<8x8xf32>
    %60 = vector.extract_strided_slice %18 {offsets = [0, 16], sizes = [8, 8], strides = [1, 1]} : vector<8x32xf32> to vector<8x8xf32>
    %cst_28 = arith.constant dense<0.000000e+00> : vector<8x8xf32>
    %61 = tpu.matmul %59, %60, %cst_28 {dimension_numbers = #tpu.dot_dimension_numbers<[1], [1], [0], [0], [0, 0, 1, 0], [], []>} : vector<8x8xf32>, vector<8x8xf32>, vector<8x8xf32> -> vector<8x8xf32>
    %62 = arith.addf %61, %26 : vector<8x8xf32>
    %cst_29 = arith.constant dense<0xFF800000> : vector<8xf32>
    %63 = vector.multi_reduction <maximumf>, %62, %cst_29 [1] : vector<8x8xf32> to vector<8xf32>
    %64 = vector.shape_cast %63 : vector<8xf32> to vector<8x1xf32>
    %65 = vector.broadcast %64 : vector<8x1xf32> to vector<8x8xf32>
    %66 = arith.subf %62, %65 : vector<8x8xf32>
    %67 = math.exp %66 : vector<8x8xf32>
    %cst_30 = arith.constant dense<0.000000e+00> : vector<8xf32>
    %68 = vector.multi_reduction <add>, %67, %cst_30 [1] : vector<8x8xf32> to vector<8xf32>
    %69 = vector.shape_cast %68 : vector<8xf32> to vector<8x1xf32>
    %70 = tpu.reciprocal %69 {approx = true} : vector<8x1xf32> -> vector<8x1xf32>
    %71 = vector.broadcast %70 : vector<8x1xf32> to vector<8x8xf32>
    %72 = arith.mulf %67, %71 : vector<8x8xf32>
    %73 = vector.extract_strided_slice %19 {offsets = [0, 16], sizes = [8, 8], strides = [1, 1]} : vector<8x32xf32> to vector<8x8xf32>
    %cst_31 = arith.constant dense<0.000000e+00> : vector<8x8xf32>
    %74 = tpu.matmul %72, %73, %cst_31 {dimension_numbers = #tpu.dot_dimension_numbers<[1], [0], [0], [1], [0, 0, 1, 1], [], []>} : vector<8x8xf32>, vector<8x8xf32>, vector<8x8xf32> -> vector<8x8xf32>
    %75 = vector.extract_strided_slice %21 {offsets = [0, 24], sizes = [8, 8], strides = [1, 1]} : vector<8x32xf32> to vector<8x8xf32>
    %76 = vector.extract_strided_slice %18 {offsets = [0, 24], sizes = [8, 8], strides = [1, 1]} : vector<8x32xf32> to vector<8x8xf32>
    %cst_32 = arith.constant dense<0.000000e+00> : vector<8x8xf32>
    %77 = tpu.matmul %75, %76, %cst_32 {dimension_numbers = #tpu.dot_dimension_numbers<[1], [1], [0], [0], [0, 0, 1, 0], [], []>} : vector<8x8xf32>, vector<8x8xf32>, vector<8x8xf32> -> vector<8x8xf32>
    %78 = arith.addf %77, %26 : vector<8x8xf32>
    %cst_33 = arith.constant dense<0xFF800000> : vector<8xf32>
    %79 = vector.multi_reduction <maximumf>, %78, %cst_33 [1] : vector<8x8xf32> to vector<8xf32>
    %80 = vector.shape_cast %79 : vector<8xf32> to vector<8x1xf32>
    %81 = vector.broadcast %80 : vector<8x1xf32> to vector<8x8xf32>
    %82 = arith.subf %78, %81 : vector<8x8xf32>
    %83 = math.exp %82 : vector<8x8xf32>
    %cst_34 = arith.constant dense<0.000000e+00> : vector<8xf32>
    %84 = vector.multi_reduction <add>, %83, %cst_34 [1] : vector<8x8xf32> to vector<8xf32>
    %85 = vector.shape_cast %84 : vector<8xf32> to vector<8x1xf32>
    %86 = tpu.reciprocal %85 {approx = true} : vector<8x1xf32> -> vector<8x1xf32>
    %87 = vector.broadcast %86 : vector<8x1xf32> to vector<8x8xf32>
    %88 = arith.mulf %83, %87 : vector<8x8xf32>
    %89 = vector.extract_strided_slice %19 {offsets = [0, 24], sizes = [8, 8], strides = [1, 1]} : vector<8x32xf32> to vector<8x8xf32>
    %cst_35 = arith.constant dense<0.000000e+00> : vector<8x8xf32>
    %90 = tpu.matmul %88, %89, %cst_35 {dimension_numbers = #tpu.dot_dimension_numbers<[1], [0], [0], [1], [0, 0, 1, 1], [], []>} : vector<8x8xf32>, vector<8x8xf32>, vector<8x8xf32> -> vector<8x8xf32>
    %91 = tpu.concatenate %42, %58, %74, %90 in 1 : vector<8x8xf32>, vector<8x8xf32>, vector<8x8xf32>, vector<8x8xf32> -> vector<8x32xf32>
    %c0_36 = arith.constant 0 : index
    %c0_37 = arith.constant 0 : index
    %92 = vector.load %arg5[%c0_36, %c0_37] : memref<32x32xf32, #tpu.memory_space<vmem>>, vector<32x32xf32>
    %cst_38 = arith.constant dense<0.000000e+00> : vector<8x32xf32>
    %93 = tpu.matmul %91, %92, %cst_38 {dimension_numbers = #tpu.dot_dimension_numbers<[1], [0], [0], [1], [0, 0, 1, 1], [], []>} : vector<8x32xf32>, vector<32x32xf32>, vector<8x32xf32> -> vector<8x32xf32>
    %c0_39 = arith.constant 0 : index
    %c0_40 = arith.constant 0 : index
    %94 = vector.load %arg6[%c0_39, %c0_40] : memref<1x32xf32, #tpu.memory_space<vmem>>, vector<1x32xf32>
    %95 = vector.broadcast %94 : vector<1x32xf32> to vector<8x32xf32>
    %96 = arith.addf %93, %95 : vector<8x32xf32>
    %97 = arith.addf %1, %96 : vector<8x32xf32>
    %cst_41 = arith.constant dense<0.000000e+00> : vector<8xf32>
    %98 = vector.multi_reduction <add>, %97, %cst_41 [1] : vector<8x32xf32> to vector<8xf32>
    %99 = vector.shape_cast %98 : vector<8xf32> to vector<8x1xf32>
    %cst_42 = arith.constant 3.200000e+01 : f32
    %100 = vector.broadcast %cst_42 : f32 to vector<8x1xf32>
    %101 = arith.divf %99, %100 : vector<8x1xf32>
    %102 = vector.broadcast %101 : vector<8x1xf32> to vector<8x32xf32>
    %103 = arith.subf %97, %102 : vector<8x32xf32>
    %104 = arith.mulf %103, %103 : vector<8x32xf32>
    %cst_43 = arith.constant dense<0.000000e+00> : vector<8xf32>
    %105 = vector.multi_reduction <add>, %104, %cst_43 [1] : vector<8x32xf32> to vector<8xf32>
    %106 = vector.shape_cast %105 : vector<8xf32> to vector<8x1xf32>
    %cst_44 = arith.constant 3.200000e+01 : f32
    %107 = vector.broadcast %cst_44 : f32 to vector<8x1xf32>
    %108 = arith.divf %106, %107 : vector<8x1xf32>
    %109 = vector.broadcast %101 : vector<8x1xf32> to vector<8x32xf32>
    %110 = arith.subf %97, %109 : vector<8x32xf32>
    %cst_45 = arith.constant 9.99999974E-6 : f32
    %111 = vector.broadcast %cst_45 : f32 to vector<8x1xf32>
    %112 = arith.addf %108, %111 : vector<8x1xf32>
    %113 = math.rsqrt %112 : vector<8x1xf32>
    %114 = vector.broadcast %113 : vector<8x1xf32> to vector<8x32xf32>
    %115 = arith.mulf %110, %114 : vector<8x32xf32>
    %116 = vector.broadcast %2 : vector<1x32xf32> to vector<8x32xf32>
    %117 = arith.mulf %115, %116 : vector<8x32xf32>
    %118 = vector.broadcast %3 : vector<1x32xf32> to vector<8x32xf32>
    %119 = arith.addf %117, %118 : vector<8x32xf32>
    %c0_46 = arith.constant 0 : index
    %c0_47 = arith.constant 0 : index
    %c0_48 = arith.constant 0 : index
    %120 = vector.load %arg11[%c0_46, %c0_47, %c0_48] : memref<1x8x32xf32, #tpu.memory_space<vmem>>, vector<1x8x32xf32>
    %121 = vector.shape_cast %120 : vector<1x8x32xf32> to vector<8x32xf32>
    %122 = vector.shape_cast %119 : vector<8x32xf32> to vector<1x8x32xf32>
    tpu.vector_store %arg11[%c0_46, %c0_47, %c0_48], %122 {strides = array<i32>} : memref<1x8x32xf32, #tpu.memory_space<vmem>>, vector<1x8x32xf32>,
    return
  }
  func.func @transform_0(%arg0: i32) -> (i32, i32, i32) {
    %c0_i32 = arith.constant 0 : i32
    %c0_i32_0 = arith.constant 0 : i32
    %c0_i32_1 = arith.constant 0 : i32
    return %arg0, %c0_i32, %c0_i32_0 : i32, i32, i32
  }
  func.func @transform_1(%arg0: i32) -> (i32, i32, i32) {
    %c0_i32 = arith.constant 0 : i32
    %c0_i32_0 = arith.constant 0 : i32
    %c0_i32_1 = arith.constant 0 : i32
    return %arg0, %c0_i32, %c0_i32_0 : i32, i32, i32
  }
  func.func @transform_2(%arg0: i32) -> (i32, i32) {
    %c0_i32 = arith.constant 0 : i32
    %c0_i32_0 = arith.constant 0 : i32
    %c0_i32_1 = arith.constant 0 : i32
    return %c0_i32, %c0_i32_0 : i32, i32
  }
  func.func @transform_3(%arg0: i32) -> (i32, i32) {
    %c0_i32 = arith.constant 0 : i32
    %c0_i32_0 = arith.constant 0 : i32
    %c0_i32_1 = arith.constant 0 : i32
    return %c0_i32, %c0_i32_0 : i32, i32
  }
  func.func @transform_4(%arg0: i32) -> (i32, i32) {
    %c0_i32 = arith.constant 0 : i32
    %c0_i32_0 = arith.constant 0 : i32
    %c0_i32_1 = arith.constant 0 : i32
    return %c0_i32, %c0_i32_0 : i32, i32
  }
  func.func @transform_5(%arg0: i32) -> (i32, i32) {
    %c0_i32 = arith.constant 0 : i32
    %c0_i32_0 = arith.constant 0 : i32
    %c0_i32_1 = arith.constant 0 : i32
    return %c0_i32, %c0_i32_0 : i32, i32
  }
  func.func @transform_6(%arg0: i32) -> (i32, i32) {
    %c0_i32 = arith.constant 0 : i32
    %c0_i32_0 = arith.constant 0 : i32
    %c0_i32_1 = arith.constant 0 : i32
    return %c0_i32, %c0_i32_0 : i32, i32
  }
  func.func @transform_7(%arg0: i32) -> (i32, i32) {
    %c0_i32 = arith.constant 0 : i32
    %c0_i32_0 = arith.constant 0 : i32
    %c0_i32_1 = arith.constant 0 : i32
    return %c0_i32, %c0_i32_0 : i32, i32
  }
  func.func @transform_8(%arg0: i32) -> (i32, i32) {
    %c0_i32 = arith.constant 0 : i32
    %c0_i32_0 = arith.constant 0 : i32
    %c0_i32_1 = arith.constant 0 : i32
    return %c0_i32, %c0_i32_0 : i32, i32
  }
  func.func @transform_9(%arg0: i32) -> (i32, i32, i32) {
    %c0_i32 = arith.constant 0 : i32
    %c0_i32_0 = arith.constant 0 : i32
    %c0_i32_1 = arith.constant 0 : i32
    return %arg0, %c0_i32, %c0_i32_0 : i32, i32, i32
  }
  func.func @transform_10(%arg0: i32) -> (i32, i32, i32) {
    %c0_i32 = arith.constant 0 : i32
    %c0_i32_0 = arith.constant 0 : i32
    %c0_i32_1 = arith.constant 0 : i32
    return %arg0, %c0_i32, %c0_i32_0 : i32, i32, i32
  }
}

module attributes {stable_mosaic.version = 11 : i64} {
  func.func @_ffn_block_kernel(%arg0: i32, %arg1: memref<16x32xf32, #tpu.memory_space<vmem>>, %arg2: memref<32x64xf32, #tpu.memory_space<vmem>>, %arg3: memref<1x64xf32, #tpu.memory_space<vmem>>, %arg4: memref<64x32xf32, #tpu.memory_space<vmem>>, %arg5: memref<1x32xf32, #tpu.memory_space<vmem>>, %arg6: memref<1x32xf32, #tpu.memory_space<vmem>>, %arg7: memref<1x32xf32, #tpu.memory_space<vmem>>, %arg8: memref<16x32xf32, #tpu.memory_space<vmem>>) attributes {dimension_semantics = [#tpu.dimension_semantics<parallel>], iteration_bounds = array<i64: 1>, scalar_prefetch = 0 : i64, scratch_operands = 0 : i64, tpu.core_type = #tpu.core_type<tc>, window_params = [{transform_indices = @transform_0, window_bounds = array<i64: 16, 32>}, {pipeline_mode = #tpu.pipeline_mode<synchronous>, transform_indices = @transform_1, window_bounds = array<i64: 32, 64>}, {pipeline_mode = #tpu.pipeline_mode<synchronous>, transform_indices = @transform_2, window_bounds = array<i64: 1, 64>}, {pipeline_mode = #tpu.pipeline_mode<synchronous>, transform_indices = @transform_3, window_bounds = array<i64: 64, 32>}, {pipeline_mode = #tpu.pipeline_mode<synchronous>, transform_indices = @transform_4, window_bounds = array<i64: 1, 32>}, {pipeline_mode = #tpu.pipeline_mode<synchronous>, transform_indices = @transform_5, window_bounds = array<i64: 1, 32>}, {pipeline_mode = #tpu.pipeline_mode<synchronous>, transform_indices = @transform_6, window_bounds = array<i64: 1, 32>}, {transform_indices = @transform_7, window_bounds = array<i64: 16, 32>}]} {
    %c0 = arith.constant 0 : index
    %c0_0 = arith.constant 0 : index
    %0 = vector.load %arg1[%c0, %c0_0] : memref<16x32xf32, #tpu.memory_space<vmem>>, vector<16x32xf32>
    %c0_1 = arith.constant 0 : index
    %c0_2 = arith.constant 0 : index
    %1 = vector.load %arg6[%c0_1, %c0_2] : memref<1x32xf32, #tpu.memory_space<vmem>>, vector<1x32xf32>
    %c0_3 = arith.constant 0 : index
    %c0_4 = arith.constant 0 : index
    %2 = vector.load %arg7[%c0_3, %c0_4] : memref<1x32xf32, #tpu.memory_space<vmem>>, vector<1x32xf32>
    %c0_5 = arith.constant 0 : index
    %c0_6 = arith.constant 0 : index
    %3 = vector.load %arg2[%c0_5, %c0_6] : memref<32x64xf32, #tpu.memory_space<vmem>>, vector<32x64xf32>
    %cst = arith.constant dense<0.000000e+00> : vector<16x64xf32>
    %4 = tpu.matmul %0, %3, %cst {dimension_numbers = #tpu.dot_dimension_numbers<[1], [0], [0], [1], [0, 0, 1, 1], [], []>} : vector<16x32xf32>, vector<32x64xf32>, vector<16x64xf32> -> vector<16x64xf32>
    %c0_7 = arith.constant 0 : index
    %c0_8 = arith.constant 0 : index
    %5 = vector.load %arg3[%c0_7, %c0_8] : memref<1x64xf32, #tpu.memory_space<vmem>>, vector<1x64xf32>
    %6 = vector.broadcast %5 : vector<1x64xf32> to vector<16x64xf32>
    %7 = arith.addf %4, %6 : vector<16x64xf32>
    %cst_9 = arith.constant 0.000000e+00 : f32
    %8 = vector.broadcast %cst_9 : f32 to vector<16x64xf32>
    %9 = arith.maximumf %7, %8 : vector<16x64xf32>
    %c0_10 = arith.constant 0 : index
    %c0_11 = arith.constant 0 : index
    %10 = vector.load %arg4[%c0_10, %c0_11] : memref<64x32xf32, #tpu.memory_space<vmem>>, vector<64x32xf32>
    %cst_12 = arith.constant dense<0.000000e+00> : vector<16x32xf32>
    %11 = tpu.matmul %9, %10, %cst_12 {dimension_numbers = #tpu.dot_dimension_numbers<[1], [0], [0], [1], [0, 0, 1, 1], [], []>} : vector<16x64xf32>, vector<64x32xf32>, vector<16x32xf32> -> vector<16x32xf32>
    %c0_13 = arith.constant 0 : index
    %c0_14 = arith.constant 0 : index
    %12 = vector.load %arg5[%c0_13, %c0_14] : memref<1x32xf32, #tpu.memory_space<vmem>>, vector<1x32xf32>
    %13 = vector.broadcast %12 : vector<1x32xf32> to vector<16x32xf32>
    %14 = arith.addf %11, %13 : vector<16x32xf32>
    %15 = arith.addf %0, %14 : vector<16x32xf32>
    %cst_15 = arith.constant dense<0.000000e+00> : vector<16xf32>
    %16 = vector.multi_reduction <add>, %15, %cst_15 [1] : vector<16x32xf32> to vector<16xf32>
    %17 = vector.shape_cast %16 : vector<16xf32> to vector<16x1xf32>
    %cst_16 = arith.constant 3.200000e+01 : f32
    %18 = vector.broadcast %cst_16 : f32 to vector<16x1xf32>
    %19 = arith.divf %17, %18 : vector<16x1xf32>
    %20 = vector.broadcast %19 : vector<16x1xf32> to vector<16x32xf32>
    %21 = arith.subf %15, %20 : vector<16x32xf32>
    %22 = arith.mulf %21, %21 : vector<16x32xf32>
    %cst_17 = arith.constant dense<0.000000e+00> : vector<16xf32>
    %23 = vector.multi_reduction <add>, %22, %cst_17 [1] : vector<16x32xf32> to vector<16xf32>
    %24 = vector.shape_cast %23 : vector<16xf32> to vector<16x1xf32>
    %cst_18 = arith.constant 3.200000e+01 : f32
    %25 = vector.broadcast %cst_18 : f32 to vector<16x1xf32>
    %26 = arith.divf %24, %25 : vector<16x1xf32>
    %27 = vector.broadcast %19 : vector<16x1xf32> to vector<16x32xf32>
    %28 = arith.subf %15, %27 : vector<16x32xf32>
    %cst_19 = arith.constant 9.99999974E-6 : f32
    %29 = vector.broadcast %cst_19 : f32 to vector<16x1xf32>
    %30 = arith.addf %26, %29 : vector<16x1xf32>
    %31 = math.rsqrt %30 : vector<16x1xf32>
    %32 = vector.broadcast %31 : vector<16x1xf32> to vector<16x32xf32>
    %33 = arith.mulf %28, %32 : vector<16x32xf32>
    %34 = vector.broadcast %1 : vector<1x32xf32> to vector<16x32xf32>
    %35 = arith.mulf %33, %34 : vector<16x32xf32>
    %36 = vector.broadcast %2 : vector<1x32xf32> to vector<16x32xf32>
    %37 = arith.addf %35, %36 : vector<16x32xf32>
    %c0_20 = arith.constant 0 : index
    %c0_21 = arith.constant 0 : index
    %38 = vector.load %arg8[%c0_20, %c0_21] : memref<16x32xf32, #tpu.memory_space<vmem>>, vector<16x32xf32>
    tpu.vector_store %arg8[%c0_20, %c0_21], %37 {strides = array<i32>} : memref<16x32xf32, #tpu.memory_space<vmem>>, vector<16x32xf32>,
    return
  }
  func.func @transform_0(%arg0: i32) -> (i32, i32) {
    %c0_i32 = arith.constant 0 : i32
    %c0_i32_0 = arith.constant 0 : i32
    return %arg0, %c0_i32 : i32, i32
  }
  func.func @transform_1(%arg0: i32) -> (i32, i32) {
    %c0_i32 = arith.constant 0 : i32
    %c0_i32_0 = arith.constant 0 : i32
    %c0_i32_1 = arith.constant 0 : i32
    return %c0_i32, %c0_i32_0 : i32, i32
  }
  func.func @transform_2(%arg0: i32) -> (i32, i32) {
    %c0_i32 = arith.constant 0 : i32
    %c0_i32_0 = arith.constant 0 : i32
    %c0_i32_1 = arith.constant 0 : i32
    return %c0_i32, %c0_i32_0 : i32, i32
  }
  func.func @transform_3(%arg0: i32) -> (i32, i32) {
    %c0_i32 = arith.constant 0 : i32
    %c0_i32_0 = arith.constant 0 : i32
    %c0_i32_1 = arith.constant 0 : i32
    return %c0_i32, %c0_i32_0 : i32, i32
  }
  func.func @transform_4(%arg0: i32) -> (i32, i32) {
    %c0_i32 = arith.constant 0 : i32
    %c0_i32_0 = arith.constant 0 : i32
    %c0_i32_1 = arith.constant 0 : i32
    return %c0_i32, %c0_i32_0 : i32, i32
  }
  func.func @transform_5(%arg0: i32) -> (i32, i32) {
    %c0_i32 = arith.constant 0 : i32
    %c0_i32_0 = arith.constant 0 : i32
    %c0_i32_1 = arith.constant 0 : i32
    return %c0_i32, %c0_i32_0 : i32, i32
  }
  func.func @transform_6(%arg0: i32) -> (i32, i32) {
    %c0_i32 = arith.constant 0 : i32
    %c0_i32_0 = arith.constant 0 : i32
    %c0_i32_1 = arith.constant 0 : i32
    return %c0_i32, %c0_i32_0 : i32, i32
  }
  func.func @transform_7(%arg0: i32) -> (i32, i32) {
    %c0_i32 = arith.constant 0 : i32
    %c0_i32_0 = arith.constant 0 : i32
    return %arg0, %c0_i32 : i32, i32
  }
}

</mosaic_0001>

<bundles_post_ra>
// kernel: decoder_block_forward.5
= control target key start
LH: loop header
LB: loop body
LE: loop exit
PB: predicated region body
PF: predicated region fallthrough
CT: control target
= control target key end

     0   :  { %vm41_vm0 = vcmask 261120   ;;  %vm140_vm1 = vcmask 523264   ;;  %s463_s1 = inlined_call_operand.vmem [shape: f32[32,64], index: 1, kind: input, shape index: {}]   ;;  %s464_s0 = inlined_call_operand.vmem [shape: f32[16,32], index: 0, kind: input, shape index: {}, may-alias: {0,7}]   ;;  %s465_s3 = inlined_call_operand.vmem [shape: f32[64,32], index: 3, kind: input, shape index: {}]   ;;  %s466_s2 = inlined_call_operand.vmem [shape: f32[1,64], index: 2, kind: input, shape index: {}]   ;;  %s467_s4 = inlined_call_operand.vmem [shape: f32[1,32], index: 4, kind: input, shape index: {}]   ;;  %s468_s5 = inlined_call_operand.vmem [shape: f32[1,32], index: 5, kind: input, shape index: {}]   ;;  %s469_s6 = inlined_call_operand.vmem [shape: f32[1,32], index: 6, kind: input, shape index: {}]   ;;  %s470_s7 = inlined_call_operand.vmem [shape: f32[16,32], index: 7, kind: output, shape index: {}, may-alias: {0,7}]  }
   0x1   :  { %v30_v0 = vld [vmem:[%s463_s1] sm:$0xff]  ;;  %v31_v1 = vld [vmem:[%s463_s1 + $0x8] sm:$0xff]  ;;  %v32_v2 = vld [vmem:[%s463_s1 + $0x10] sm:$0xff] }
   0x2   :  { %v327_v3 = vpack.c.bf16 %v31_v1, %v30_v0  ;;  %v33_v4 = vld [vmem:[%s463_s1 + $0x18] sm:$0xff]  ;;  %v26_v5 = vld [vmem:[%s464_s0] sm:$0xff]  ;;  %v126_v8 = vld [vmem:[%s465_s3 + $0x8] sm:$0xff] }
   0x3   :  { %v331_v6 = vpack.c.bf16 %v33_v4, %v32_v2  ;;  %305 = vmatprep.mubr.msk.f32.mxu0 %vm41_vm0, %v26_v5  ;;  %v125_v7 = vld [vmem:[%s465_s3] sm:$0xff]  ;;  %v127_v9 = vld [vmem:[%s465_s3 + $0x10] sm:$0xff]  ;;  %v128_v11 = vld [vmem:[%s465_s3 + $0x18] sm:$0xff] }
   0x4   :  { %328 = vmatprep.subr.bf16.mxu0 %v327_v3  ;;  %v335_v10 = vpack.c.bf16 %v126_v8, %v125_v7  ;;  %v339_v12 = vpack.c.bf16 %v128_v11, %v127_v9  ;;  %v129_v13 = vld [vmem:[%s465_s3 + $0x20] sm:$0xff]  ;;  %v130_v14 = vld [vmem:[%s465_s3 + $0x28] sm:$0xff]  ;;  %v131_v17 = vld [vmem:[%s465_s3 + $0x30] sm:$0xff] }
   0x5   :  { %330 = vmatpush3.bf16.msra.mxu0 %v327_v3  ;;  %v343_v15 = vpack.c.bf16 %v130_v14, %v129_v13  ;;  %v27_v16 = vld [vmem:[%s464_s0 + $0x8] sm:$0xff]  ;;  %v132_v18 = vld [vmem:[%s465_s3 + $0x38] sm:$0xff]  ;;  %v273_v20 = vld [vmem:[%s466_s2] ss:$0 sm:$0xff] }
   0x6   :  { %332 = vmatprep.subr.bf16.mxu0 %v331_v6  ;;  %336 = vmatprep.subr.bf16.mxu1 %v335_v10  ;;  %v347_v19 = vpack.c.bf16 %v132_v18, %v131_v17  ;;  %v276_v27 = vld [vmem:[%s467_s4] ss:$0 sm:$0xff] }
   0x7   :  { %338 = vmatpush3.bf16.msra.mxu1 %v335_v10  ;;  %v279_v53 = vld [vmem:[%s468_s5] ss:$0 sm:$0xff] }
   0x8   :  { %340 = vmatprep.subr.bf16.mxu1 %v339_v12  ;;  %v280_v55 = vld [vmem:[%s469_s6] ss:$0 sm:$0xff] }
   0x9   :  { %334 = vmatpush3.bf16.msra.mxu0 %v331_v6 }
   0xb   :  { %342 = vmatpush3.bf16.msra.mxu1 %v339_v12 }
   0xc   :  { %306 = vmatmul.mubr.msk.f32.vlgmr.msra.gmra.mrb[0].mxu0 %vm41_vm0, %v27_v16  ;;  %344 = vmatprep.subr.bf16.mxu1 %v343_v15 }
   0xf   :  { %346 = vmatpush3.bf16.msra.mxu1 %v343_v15 }
  0x10   :  { %348 = vmatprep.subr.bf16.mxu1 %v347_v19 }
  0x13   :  { %350 = vmatpush3.bf16.msra.mxu1 %v347_v19 }
  0xdf   :  { %v307_v21 = vpop.f32.mrb[0].mxu0 }
  0xe0   :  { %v120_v22 = vadd.f32 %v307_v21, %v273_v20  ;;  %v114_v23 = vpop.f32.mrb[1].mxu0 }
  0xe1   :  { %v115_v24 = vadd.f32 %v273_v20, %v114_v23 }
  0xe2   :  { %v124_v26 = vmax.f32 %v120_v22, 0.0 }
  0xe3   :  { %v123_v25 = vmax.f32 %v115_v24, 0.0 }
  0xe5   :  { %324 = vmatprep.mubr.msk.f32.mxu1 %vm140_vm1, %v123_v25 }
  0xe6   :  { %325 = vmatmul.mubr.msk.f32.vlgmr.msra.gmra.mrb[0].mxu1 %vm140_vm1, %v124_v26 }
 0x1b9   :  { %v326_v28 = vpop.f32.mrb[0].mxu1 }
 0x1ba   :  { %v213_v29 = vpop.f32.mrb[1].mxu1  ;;  %v219_v30 = vadd.f32 %v326_v28, %v276_v27 }
 0x1bb   :  { %v214_v31 = vadd.f32 %v276_v27, %v213_v29 }
 0x1bc   :  { %v223_v34 = vadd.f32 %v219_v30, %v27_v16 }
 0x1bd   :  { %v222_v32 = vadd.f32 %v214_v31, %v26_v5 }
 0x1be   :  { %v227_v35 = vsel %vm41_vm0, %v223_v34, 0.0 }
 0x1bf   :  { %v224_v33 = vsel %vm41_vm0, %v222_v32, 0.0 }
 0x1c0   :  { %225 = vadd.xlane.f32.xlu0 %v224_v33 }
 0x1c4   :  { %228 = vadd.xlane.f32.xlu0 %v227_v35 }
 0x24d   :  { %v226_v36 = vpop.xlane.xlu0 %225 }
 0x24e   :  { %v231_v37 = vmul.f32 0.03125, %v226_v36 }
 0x250   :  { %v233_v38 = vsub.f32 %v222_v32, %v231_v37 }
 0x251   :  { %v229_v39 = vpop.xlane.xlu0 %228 }
 0x252   :  { %v232_v40 = vmul.f32 0.03125, %v229_v39  ;;  %v235_v41 = vmul.f32 %v233_v38, %v233_v38 }
 0x254   :  { %v234_v42 = vsub.f32 %v223_v34, %v232_v40  ;;  %v237_v43 = vsel %vm41_vm0, %v235_v41, 0.0 }
 0x255   :  { %238 = vadd.xlane.f32.xlu1 %v237_v43 }
 0x256   :  { %v236_v44 = vmul.f32 %v234_v42, %v234_v42 }
 0x258   :  { %v240_v45 = vsel %vm41_vm0, %v236_v44, 0.0 }
 0x259   :  { %241 = vadd.xlane.f32.xlu1 %v240_v45 }
 0x2e2   :  { %v239_v46 = vpop.xlane.xlu1 %238 }
 0x2e3   :  { %v243_v47 = vmul.f32 0.03125, %v239_v46 }
 0x2e5   :  { %v245_v48 = vadd.f32 1e-05, %v243_v47 }
 0x2e6   :  { %v242_v49 = vpop.xlane.xlu1 %241 }
 0x2e7   :  { %351 = vrsqrt.f32 %v245_v48  ;;  %v244_v50 = vmul.f32 0.03125, %v242_v49 }
 0x2e9   :  { %v246_v51 = vadd.f32 1e-05, %v244_v50 }
 0x2eb   :  { %353 = vrsqrt.f32 %v246_v51 }
 0x2f1   :  { %v352_v52 = vpop.eup %351 }
 0x2f2   :  { %v249_v54 = vmul.f32 %v352_v52, %v233_v38 }
 0x2f4   :  { %v257_v56 = vmul.f32 %v279_v53, %v249_v54 }
 0x2f5   :  { %v354_v57 = vpop.eup %353 }
 0x2f6   :  { %v265_v58 = vadd.f32 %v280_v55, %v257_v56  ;;  %v250_v59 = vmul.f32 %v354_v57, %v234_v42 }
 0x2f8   :  { %267 = vst.msk [vmem:[%s470_s7] sm:$0xff] %vm41_vm0, %v265_v58  ;;  %v258_v60 = vmul.f32 %v279_v53, %v250_v59 }
 0x2fa   :  { %v266_v61 = vadd.f32 %v280_v55, %v258_v60 }
 0x2fc   :  { %268 = vst.msk [vmem:[%s470_s7 + $0x8] sm:$0xff] %vm41_vm0, %v266_v61 }

// kernel: decoder_block_forward.3
= control target key start
LH: loop header
LB: loop body
LE: loop exit
PB: predicated region body
PF: predicated region fallthrough
CT: control target
= control target key end

     0   :  { %s1540_s30 = smov 0   ;;  %s1683_s0 = inlined_call_operand.vmem [shape: f32[2,8,32], index: 0, kind: input, shape index: {}, may-alias: {0,9}]   ;;  %s1684_s1 = inlined_call_operand.vmem [shape: f32[32,96], index: 1, kind: input, shape index: {}]   ;;  %s1685_s2 = inlined_call_operand.vmem [shape: f32[1,96], index: 2, kind: input, shape index: {}]   ;;  %s1686_s3 = inlined_call_operand.vmem [shape: f32[32,32], index: 3, kind: input, shape index: {}]   ;;  %s1687_s4 = inlined_call_operand.vmem [shape: f32[1,32], index: 4, kind: input, shape index: {}]   ;;  %s1688_s5 = inlined_call_operand.vmem [shape: f32[1,32], index: 5, kind: input, shape index: {}]   ;;  %s1689_s6 = inlined_call_operand.vmem [shape: f32[1,32], index: 6, kind: input, shape index: {}]   ;;  %s1690_s7 = inlined_call_operand.vmem [shape: f32[8,8], index: 7, kind: input, shape index: {}]   ;;  %s1691_s8 = inlined_call_operand.vmem [shape: f32[2,1,8], index: 8, kind: input, shape index: {}]   ;;  %s1692_s9 = inlined_call_operand.vmem [shape: f32[2,8,32], index: 9, kind: output, shape index: {}, may-alias: {0,9}]  }
   0x1 LB: > { %s1294_s10 = sadd.s32 4294967295, %s1471_s30   ;;  %p1298_p0 = scmp.ge.s32.totalorder %s1471_s30, 1  ;;  %s1471_s30 = sphi %s1540_s30, %s19_s30  }
   0x2   : > { %p294_p1 = scmp.lt.s32.totalorder %s1471_s30, 3 }
   0x4   : > { %p295_p2 = pnand %p1298_p0, %p294_p1 }
   0x5   : > { %v345_v0 = vld [vmem:[%s1684_s1] sm:$0xff] (!%p295_p2)  ;;  %v346_v1 = vld [vmem:[%s1684_s1 + $0x8] sm:$0xff] (!%p295_p2)  ;;  %v347_v2 = vld [vmem:[%s1684_s1 + $0x10] sm:$0xff] (!%p295_p2)  ;;  %v1473_v3 = vmov (!%p295_p2), 0.0|0.0   ;;  %vm1474_vm0 = vmmov (!%p295_p2), 0   ;;  %v1475_v6 = vmov (!%p295_p2), 0.0  }
   0x6   : > { %298 = sbr.rel (%p295_p2) target bundleno = 2315 (0x90b), region = 56  ;;  %1410 = vmatprep.subr.bf16.mxu0 (!%p295_p2), %v1473_v3  ;;  %v1411_v4 = vpack.c.bf16 (!%p295_p2), %v346_v1, %v345_v0  ;;  %v348_v5 = vld [vmem:[%s1684_s1 + $0x18] sm:$0xff] (!%p295_p2)  ;;  %1356 = vmatprep.mubr.msk.f32.mxu0 (!%p295_p2), %vm1474_vm0, %v1475_v6  ;;  %p331_p3 = scmp.lt.s32.totalorder (!%p295_p2), %s1294_s10, 1  ;;  %vm356_vm1 = vcmask (!%p295_p2), 261120   ;;  %v1301_v9 = vld [vmem:[%s1685_s2] ss:$0 sm:$0xff] (!%p295_p2) }
   0x7   : > { %1359 = vmatprep.subr.mxu1 (!%p295_p2), %v1475_v6  ;;  %1361 = vmatprep.mubr.msk.f32.mxu1 (!%p295_p2), %vm1474_vm0, %v1475_v6  ;;  %v1414_v7 = vpack.c.bf16 (!%p295_p2), %v348_v5, %v347_v2  ;;  %s1476_s25 = smov (!%p295_p2), 64   ;;  %s1477_s26 = smov (!%p295_p2), 96   ;;  %vm443_vm2 = vcmask (!%p295_p2), 64512   ;;  %v431_v20 = vld [vmem:[%s1690_s7] sm:$0xff] (!%p295_p2)  ;;  %vm1114_vm3 = vcmask (!%p295_p2), 130048   ;;  %vm1116_vm4 = vcmask (!%p295_p2), 195584  }
   0x8   : > { %1412 = vmatpush3.bf16.msra.mxu0 (!%p295_p2), %v1411_v4  ;;  %s1478_s27 = smov (!%p295_p2), 88   ;;  %s1479_s28 = smov (!%p295_p2), 120  }
   0x9   : > { %1413 = vmatprep.subr.bf16.mxu0 (!%p295_p2), %v1473_v3  ;;  %s1480_s29 = smov (!%p295_p2), 80   ;;  %s1481_s16 = smov (!%p295_p2), 72  }
   0xa   : > { %s1482_s17 = smov (!%p295_p2), 112   ;;  %s1483_s18 = smov (!%p295_p2), 104  }
   0xb   : > { %s1484_s20 = smov (!%p295_p2), 56   ;;  %s1485_s21 = smov (!%p295_p2), 48  }
   0xc   : > { %1415 = vmatpush3.bf16.msra.mxu0 (!%p295_p2), %v1414_v7  ;;  %s1487_s12 = smov (!%p295_p2), 8   ;;  %s1489_s14 = smov (!%p295_p2), 24  }
   0xd   : > { %s1694_s10 = smov (!%p331_p3, %s1294_s10), 1  ;;  %1379 = vmatprep.subr.mxu0 %v1475_v6 }
   0xe   : > { %s1299_s19 = sshll.u32 %s1694_s10, 3  ;;  %s337_s13 = scalar_lea.vmem %s1691_s8, %s1694_s10 }
   0xf   : > { %s334_s22 = scalar_lea.vmem %s1683_s0, %s1299_s19  ;;  %v1303_v19 = vld [vmem:[%s337_s13] ss:$0 sm:$0xff]  ;;  %s1488_s13 = smov 16  }
  0x10   : > { %v1575_v8 = vld [vmem:[%s334_s22] sm:$0xff]  ;;  %v439_v21 = vadd.f32 %v1303_v19, %v431_v20  ;;  %s1486_s22 = smov 40   ;;  %v1120_v20 = vld [vmem:[%s1686_s3 + $0x10] sm:$0xff]  ;;  %s341_s24 = scalar_lea.vmem %s1692_s9, %s1299_s19 }
  0x11   : > { %1357 = vmatmul.mubr.msk.f32.vlgmr.msra.gmra.mrb[0].mxu0 %vm356_vm1, %v1575_v8 }
  0x12   : > { %1381 = vmatprep.mubr.msk.f32.mxu0 %vm1474_vm0, %v1475_v6 }
  0xe4   : > { %v426_v10 = vpop.f32.mrb[0].mxu0 }
  0xe5   : > { %v1585_v11 = vadd.f32 %v1301_v9, %v426_v10  ;;  %v1358_v12 = vpop.f32.mrb[1].mxu0 }
  0xe7   : > { %530 = vrot.lane.b32.xlu1 %v1585_v11, %s1476_s25  ;;  %441 = vrot.lane.b32.xlu0 %v1585_v11, %s1477_s26  ;;  %v430_v13 = vmul.f32 0.35355338, %v1585_v11 }
  0xeb   : > { %608 = vrot.lane.b32.xlu1 %v1585_v11, %s1478_s27 }
  0xef   : > { %606 = vrot.lane.b32.xlu1 %v430_v13, %s1479_s28 }
  0xf3   : > { %773 = vrot.lane.b32.xlu1 %v1585_v11, %s1480_s29 }
 0x159   : > { %v531_v14 = vpop.permute.xlu1 %530  ;;  %v442_v15 = vpop.permute.xlu0 %441 }
 0x15a   : > { %1360 = vmatpush3.xpose.msk.msra.mxu1 %vm443_vm2, %v442_v15 }
 0x15b   : > { %1364 = vmatprep.subr.mxu1 %v1475_v6 }
 0x15d   : > { %v609_v16 = vpop.permute.xlu1 %608  ;;  %1362 = vmatmul.mubr.msk.f32.vlgmr.msra.gmra.mrb[0].mxu1 %vm443_vm2, %v430_v13 }
 0x15e   : > { %1365 = vmatpush3.msra.mxu1 %v531_v14  ;;  %1366 = vmatprep.mubr.msk.f32.mxu1 %vm1474_vm0, %v1475_v6 }
 0x15f   : > { %1369 = vmatprep.subr.mxu1 %v1475_v6 }
 0x161   : > { %v607_v17 = vpop.permute.xlu1 %606 }
 0x165   : > { %v774_v18 = vpop.permute.xlu1 %773 }
 0x166   : > { %1380 = vmatpush3.xpose.msk.msra.mxu0 %vm443_vm2, %v774_v18  ;;  %v1119_v18 = vld [vmem:[%s1686_s3 + $0x8] sm:$0xff] }
 0x167   : > { %1389 = vmatprep.subr.mxu0 %v1475_v6 }
 0x230   : > { %v515_v22 = vpop.f32.mrb[0].mxu1 }
 0x231   : > { %v516_v23 = vadd.f32 %v515_v22, %v439_v21  ;;  %v1363_v24 = vpop.f32.mrb[1].mxu1 }
 0x233   : > { %v519_v25 = vsel %vm443_vm2, %v516_v23, -inf }
 0x234   : > { %520 = vmax.xlane.f32.xlu0 %v519_v25 }
 0x24a   : > { %938 = vrot.lane.b32.xlu0 %v1585_v11, %s1481_s16 }
 0x2c1   : > { %v521_v26 = vpop.xlane.xlu0 %520 }
 0x2c2   : > { %v522_v27 = vsub.f32 %v516_v23, %v521_v26 }
 0x2c4   : > { %v523_v28 = vmul.f32 1.442695, %v522_v27 }
 0x2c5   : > { %v939_v33 = vpop.permute.xlu0 %938 }
 0x2c6   : > { %1447 = vpow2.f32 %v523_v28 }
 0x2d0   : > { %v1448_v29 = vpop.eup %1447 }
 0x2d1   : > { %v525_v30 = vsel %vm443_vm2, %v1448_v29, 0.0 }
 0x2d2   : > { %526 = vadd.xlane.f32.xlu1 %v525_v30 }
 0x2e3   : > { %771 = vrot.lane.b32.xlu1 %v430_v13, %s1482_s17 }
 0x2e7   : > { %936 = vrot.lane.b32.xlu1 %v430_v13, %s1483_s18 }
 0x35f   : > { %v527_v31 = vpop.xlane.xlu1 %526 }
 0x360   : > { %1449 = vrcp.f32 %v527_v31 }
 0x363   : > { %v772_v32 = vpop.permute.xlu1 %771 }
 0x364   : > { %1382 = vmatmul.mubr.msk.f32.vlgmr.msra.gmra.mrb[2].mxu0 %vm443_vm2, %v772_v32 }
 0x365   : > { %1390 = vmatpush3.xpose.msk.msra.mxu0 %vm443_vm2, %v939_v33  ;;  %1391 = vmatprep.mubr.msk.f32.mxu0 %vm1474_vm0, %v1475_v6  ;;  %v1316_v33 = vld [vmem:[%s1687_s4] ss:$0 sm:$0xff] }
 0x366   : > { %1416 = vmatprep.subr.bf16.mxu0 %v1473_v3 }
 0x367   : > { %v937_v34 = vpop.permute.xlu1 %936 }
 0x368   : > { %1392 = vmatmul.mubr.msk.f32.vlgmr.msra.gmra.mrb[4].mxu0 %vm443_vm2, %v937_v34 }
 0x369   : > { %1407 = vmatprep.mubr.msk.f32.mxu0 %vm1474_vm0, %v1475_v6 }
 0x36a   : > { %v1450_v35 = vpop.eup %1449 }
 0x36b   : > { %v529_v36 = vmul.f32 %v1450_v35, %v1448_v29 }
 0x36d   : > { %1367 = vmatmul.mubr.msk.f32.vlgmr.msra.gmra.mrb[2].mxu1 %vm443_vm2, %v529_v36 }
 0x36e   : > { %1370 = vmatpush3.xpose.msk.msra.mxu1 %vm443_vm2, %v609_v16  ;;  %1371 = vmatprep.mubr.msk.f32.mxu1 %vm1474_vm0, %v1475_v6 }
 0x36f   : > { %1374 = vmatprep.subr.mxu1 %v1475_v6 }
 0x371   : > { %1372 = vmatmul.mubr.msk.f32.vlgmr.msra.gmra.mrb[4].mxu1 %vm443_vm2, %v607_v17  ;;  %v1118_v17 = vld [vmem:[%s1686_s3] sm:$0xff] }
 0x372   : > { %1376 = vmatprep.mubr.msk.f32.mxu1 %vm1474_vm0, %v1475_v6  ;;  %v1417_v19 = vpack.c.bf16 %v1119_v18, %v1118_v17 }
 0x374   : > { %1418 = vmatpush3.bf16.msra.mxu0 %v1417_v19 }
 0x375   : > { %1419 = vmatprep.subr.bf16.mxu0 %v1473_v3 }
 0x437   : > { %v845_v37 = vpop.f32.mrb[2].mxu0 }
 0x438   : > { %v846_v38 = vadd.f32 %v845_v37, %v439_v21  ;;  %v1383_v39 = vpop.f32.mrb[3].mxu0 }
 0x43a   : > { %v849_v40 = vsel %vm443_vm2, %v846_v38, -inf }
 0x43b   : > { %850 = vmax.xlane.f32.xlu0 %v849_v40  ;;  %v1010_v41 = vpop.f32.mrb[4].mxu0 }
 0x43c   : > { %v1393_v42 = vpop.f32.mrb[5].mxu0  ;;  %v1011_v48 = vadd.f32 %v1010_v41, %v439_v21 }
 0x43e   : > { %v1014_v50 = vsel %vm443_vm2, %v1011_v48, -inf }
 0x440   : > { %v1627_v43 = vpop.f32.mrb[2].mxu1 }
 0x441   : > { %v1368_v44 = vpop.f32.mrb[3].mxu1 }
 0x444   : > { %v680_v45 = vpop.f32.mrb[4].mxu1 }
 0x445   : > { %v681_v46 = vadd.f32 %v680_v45, %v439_v21  ;;  %v1373_v47 = vpop.f32.mrb[5].mxu1 }
 0x447   : > { %v684_v49 = vsel %vm443_vm2, %v681_v46, -inf }
 0x448   : > { %685 = vmax.xlane.f32.xlu1 %v684_v49  ;;  %v1319_v49 = vld [vmem:[%s1689_s6] ss:$0 sm:$0xff] }
 0x44c   : > { %1015 = vmax.xlane.f32.xlu1 %v1014_v50 }
 0x4c8   : > { %v851_v51 = vpop.xlane.xlu0 %850 }
 0x4c9   : > { %v852_v52 = vsub.f32 %v846_v38, %v851_v51 }
 0x4cb   : > { %v853_v53 = vmul.f32 1.442695, %v852_v52 }
 0x4cd   : > { %1451 = vpow2.f32 %v853_v53 }
 0x4d5   : > { %v686_v54 = vpop.xlane.xlu1 %685 }
 0x4d6   : > { %v687_v62 = vsub.f32 %v681_v46, %v686_v54 }
 0x4d7   : > { %v1452_v55 = vpop.eup %1451 }
 0x4d8   : > { %v855_v56 = vsel %vm443_vm2, %v1452_v55, 0.0  ;;  %v688_v63 = vmul.f32 1.442695, %v687_v62 }
 0x4d9   : > { %856 = vadd.xlane.f32.xlu1 %v855_v56  ;;  %v1016_v57 = vpop.xlane.xlu1 %1015 }
 0x4da   : > { %v1017_v58 = vsub.f32 %v1011_v48, %v1016_v57 }
 0x4dc   : > { %v1018_v59 = vmul.f32 1.442695, %v1017_v58 }
 0x4de   : > { %1453 = vpow2.f32 %v1018_v59 }
 0x4df   : > { %1455 = vpow2.f32 %v688_v63 }
 0x4e8   : > { %v1454_v60 = vpop.eup %1453 }
 0x4e9   : > { %v1020_v61 = vsel %vm443_vm2, %v1454_v60, 0.0  ;;  %v1456_v0 = vpop.eup %1455 }
 0x4ea   : > { %695 = vrot.lane.b32.xlu1 %v1585_v11, %s1484_s20  ;;  %1021 = vadd.xlane.f32.xlu0 %v1020_v61  ;;  %v690_v1 = vsel %vm443_vm2, %v1456_v0, 0.0 }
 0x500   : > { %860 = vrot.lane.b32.xlu0 %v1585_v11, %s1485_s21 }
 0x50e   : > { %691 = vadd.xlane.f32.xlu1 %v690_v1 }
 0x51f   : > { %1025 = vrot.lane.b32.xlu1 %v1585_v11, %s1486_s22 }
 0x566   : > { %v857_v2 = vpop.xlane.xlu1 %856 }
 0x56a   : > { %v696_v4 = vpop.permute.xlu1 %695 }
 0x56b   : > { %1375 = vmatpush3.msra.mxu1 %v696_v4 }
 0x56c   : > { %1384 = vmatprep.subr.mxu1 %v1475_v6 }
 0x577   : > { %v1022_v7 = vpop.xlane.xlu0 %1021 }
 0x57b   : > { %v861_v13 = vpop.permute.xlu0 %860 }
 0x59b   : > { %v692_v5 = vpop.xlane.xlu1 %691 }
 0x59c   : > { %1457 = vrcp.f32 %v692_v5 }
 0x59d   : > { %1459 = vrcp.f32 %v857_v2 }
 0x59e   : > { %1461 = vrcp.f32 %v1022_v7 }
 0x59f   : > { %v1026_v15 = vpop.permute.xlu1 %1025 }
 0x5a6   : > { %v1458_v9 = vpop.eup %1457 }
 0x5a7   : > { %v694_v10 = vmul.f32 %v1458_v9, %v1456_v0  ;;  %v1460_v12 = vpop.eup %1459 }
 0x5a8   : > { %v859_v11 = vmul.f32 %v1460_v12, %v1452_v55  ;;  %v1462_v14 = vpop.eup %1461 }
 0x5a9   : > { %1377 = vmatmul.mubr.msk.f32.vlgmr.msra.gmra.mrb[6].mxu1 %vm443_vm2, %v694_v10  ;;  %v1024_v16 = vmul.f32 %v1462_v14, %v1454_v60 }
 0x5aa   : > { %1385 = vmatpush3.msra.mxu1 %v861_v13  ;;  %1386 = vmatprep.mubr.msk.f32.mxu1 %vm1474_vm0, %v1475_v6 }
 0x5ab   : > { %1394 = vmatprep.subr.mxu1 %v1475_v6 }
 0x5ad   : > { %1387 = vmatmul.mubr.msk.f32.vlgmr.msra.gmra.mrb[8].mxu1 %vm443_vm2, %v859_v11 }
 0x5ae   : > { %1395 = vmatpush3.msra.mxu1 %v1026_v15  ;;  %1396 = vmatprep.mubr.msk.f32.mxu1 %vm1474_vm0, %v1475_v6  ;;  %v1121_v6 = vld [vmem:[%s1686_s3 + $0x18] sm:$0xff] }
 0x5af   : > { %v1420_v21 = vpack.c.bf16 %v1121_v6, %v1120_v20 }
 0x5b1   : > { %1397 = vmatmul.mubr.msk.f32.vlgmr.msra.gmra.mrb[10].mxu1 %vm443_vm2, %v1024_v16  ;;  %1421 = vmatpush3.bf16.msra.mxu0 %v1420_v21 }
 0x67c   : > { %v767_v22 = vpop.f32.mrb[6].mxu1 }
 0x67d   : > { %1102 = vrot.lane.b32.xlu1 %v767_v22, %s1487_s12  ;;  %v1378_v23 = vpop.f32.mrb[7].mxu1 }
 0x680   : > { %v932_v24 = vpop.f32.mrb[8].mxu1 }
 0x681   : > { %1106 = vrot.lane.b32.xlu0 %v932_v24, %s1488_s13  ;;  %v1388_v25 = vpop.f32.mrb[9].mxu1 }
 0x684   : > { %v1097_v26 = vpop.f32.mrb[10].mxu1 }
 0x685   : > { %1110 = vrot.lane.b32.xlu1 %v1097_v26, %s1489_s14  ;;  %v1398_v3 = vpop.f32.mrb[11].mxu1 }
 0x6ef   : > { %v1103_v27 = vpop.permute.xlu1 %1102 }
 0x6f0   : > { %v1113_v29 = vsel %vm443_vm2, %v1627_v43, %v1103_v27 }
 0x6f3   : > { %v1107_v28 = vpop.permute.xlu0 %1106 }
 0x6f4   : > { %v1115_v30 = vsel %vm1114_vm3, %v1113_v29, %v1107_v28 }
 0x6f7   : > { %v1111_v31 = vpop.permute.xlu1 %1110 }
 0x6f8   : > { %v1117_v32 = vsel %vm1116_vm4, %v1115_v30, %v1111_v31 }
 0x6f9   : > { %1408 = vmatmul.mubr.msk.f32.vlgmr.msra.gmra.mrb[6].mxu0 %vm356_vm1, %v1117_v32 }
 0x7cc   : > { %v1198_v34 = vpop.f32.mrb[6].mxu0 }
 0x7cd   : > { %v1199_v35 = vadd.f32 %v1316_v33, %v1198_v34  ;;  %v1409_v36 = vpop.f32.mrb[7].mxu0 }
 0x7cf   : > { %v1202_v37 = vadd.f32 %v1199_v35, %v1575_v8  ;;  %v1318_v8 = vld [vmem:[%s1688_s5] ss:$0 sm:$0xff] }
 0x7d1   : > { %v1203_v38 = vsel %vm356_vm1, %v1202_v37, 0.0 }
 0x7d2   : > { %1204 = vadd.xlane.f32.xlu0 %v1203_v38 }
 0x85f   : > { %v1205_v39 = vpop.xlane.xlu0 %1204 }
 0x860   : > { %v1207_v40 = vmul.f32 0.03125, %v1205_v39 }
 0x862   : > { %v1208_v41 = vsub.f32 %v1202_v37, %v1207_v40 }
 0x864   : > { %v1209_v42 = vmul.f32 %v1208_v41, %v1208_v41 }
 0x866   : > { %v1210_v43 = vsel %vm356_vm1, %v1209_v42, 0.0 }
 0x867   : > { %1211 = vadd.xlane.f32.xlu1 %v1210_v43 }
 0x8f4   : > { %v1212_v44 = vpop.xlane.xlu1 %1211 }
 0x8f5   : > { %v1213_v45 = vmul.f32 0.03125, %v1212_v44 }
 0x8f7   : > { %v1214_v46 = vadd.f32 1e-05, %v1213_v45 }
 0x8f9   : > { %1463 = vrsqrt.f32 %v1214_v46 }
 0x903   : > { %v1464_v47 = vpop.eup %1463 }
 0x904   : > { %v1216_v48 = vmul.f32 %v1464_v47, %v1208_v41 }
 0x906   : > { %v1223_v50 = vmul.f32 %v1318_v8, %v1216_v48 }
 0x908   : > { %v1230_v51 = vadd.f32 %v1319_v49, %v1223_v50 }
 0x90a   : > { %1231 = vst.msk [vmem:[%s341_s24] sm:$0xff] %vm356_vm1, %v1230_v51 }
 0x90b PF: > { %s19_s30 = sadd.s32 1, %s1471_s30  }
 0x90c   : > { %p16_p4 = scmp.ge.s32.totalorder %s19_s30, 4  }
 0x90e   :  { %18 = sbr.rel (!%p16_p4) target bundleno = 1 (0x1), region = 89 }

// kernel: decoder_block_forward.4
= control target key start
LH: loop header
LB: loop body
LE: loop exit
PB: predicated region body
PF: predicated region fallthrough
CT: control target
= control target key end

     0   :  { %s1718_s13 = smov 0   ;;  %s1870_s0 = inlined_call_operand.vmem [shape: f32[2,8,32], index: 0, kind: input, shape index: {}, may-alias: {0,10}]   ;;  %s1871_s1 = inlined_call_operand.vmem [shape: f32[2,8,32], index: 1, kind: input, shape index: {}]   ;;  %s1872_s2 = inlined_call_operand.vmem [shape: f32[32,96], index: 2, kind: input, shape index: {}]   ;;  %s1873_s3 = inlined_call_operand.vmem [shape: f32[1,96], index: 3, kind: input, shape index: {}]   ;;  %s1874_s4 = inlined_call_operand.vmem [shape: f32[32,32], index: 4, kind: input, shape index: {}]   ;;  %s1875_s5 = inlined_call_operand.vmem [shape: f32[1,32], index: 5, kind: input, shape index: {}]   ;;  %s1876_s6 = inlined_call_operand.vmem [shape: f32[1,32], index: 6, kind: input, shape index: {}]   ;;  %s1877_s7 = inlined_call_operand.vmem [shape: f32[1,32], index: 7, kind: input, shape index: {}]   ;;  %s1878_s8 = inlined_call_operand.vmem [shape: f32[8,8], index: 8, kind: input, shape index: {}]   ;;  %s1879_s9 = inlined_call_operand.vmem [shape: f32[2,1,8], index: 9, kind: input, shape index: {}]   ;;  %s1880_s10 = inlined_call_operand.vmem [shape: f32[2,8,32], index: 10, kind: output, shape index: {}, may-alias: {0,10}]  }
   0x1 LB: > { %s1441_s14 = sadd.s32 4294967295, %s1648_s13   ;;  %p1445_p0 = scmp.ge.s32.totalorder %s1648_s13, 1  ;;  %s1648_s13 = sphi %s1718_s13, %s20_s13  }
   0x2   : > { %p328_p1 = scmp.lt.s32.totalorder %s1648_s13, 3 }
   0x4   : > { %p329_p2 = pnand %p1445_p0, %p328_p1 }
   0x5   : > { %v389_v0 = vld [vmem:[%s1872_s2] sm:$0xff] (!%p329_p2)  ;;  %v390_v1 = vld [vmem:[%s1872_s2 + $0x8] sm:$0xff] (!%p329_p2)  ;;  %v391_v2 = vld [vmem:[%s1872_s2 + $0x10] sm:$0xff] (!%p329_p2)  ;;  %v1650_v5 = vmov (!%p329_p2), 0.0|0.0   ;;  %p371_p3 = scmp.lt.s32.totalorder (!%p329_p2), %s1441_s14, 1  ;;  %vm1651_vm0 = vmmov (!%p329_p2), 0  }
   0x6   : > { %332 = sbr.rel (%p329_p2) target bundleno = 1860 (0x744), region = 60  ;;  %v1614_v3 = vpack.i.bf16 (!%p329_p2), %v390_v1, %v389_v0  ;;  %v392_v4 = vld [vmem:[%s1872_s2 + $0x18] sm:$0xff] (!%p329_p2)  ;;  %1575 = vmatprep.subr.bf16.mxu0 (!%p329_p2), %v1650_v5  ;;  %v1576_v6 = vpack.c.bf16 (!%p329_p2), %v390_v1, %v389_v0  ;;  %1581 = vmatprep.subr.bf16.mxu1 (!%p329_p2), %v1650_v5  ;;  %v1449_v7 = vld [vmem:[%s1873_s3] ss:$0 sm:$0xff] (!%p329_p2)  ;;  %v1652_v8 = vmov (!%p329_p2), 0.0   ;;  %s1653_s25 = smov (!%p329_p2), 96  }
   0x7   : > { %1510 = vmatprep.mubr.msk.f32.mxu0 (!%p329_p2), %vm1651_vm0, %v1652_v8  ;;  %1521 = vmatprep.mubr.msk.f32.mxu1 (!%p329_p2), %vm1651_vm0, %v1652_v8  ;;  %v1619_v9 = vpack.i.bf16 (!%p329_p2), %v392_v4, %v391_v2  ;;  %v1579_v10 = vpack.c.bf16 (!%p329_p2), %v392_v4, %v391_v2  ;;  %vm401_vm1 = vcmask (!%p329_p2), 261120   ;;  %s1654_s15 = smov (!%p329_p2), 120   ;;  %s1655_s16 = smov (!%p329_p2), 112   ;;  %vm577_vm2 = vcmask (!%p329_p2), 64512   ;;  %v568_v35 = vld [vmem:[%s1878_s8] sm:$0xff] (!%p329_p2) }
   0x8   : > { %1615 = vrot.lane.b32.xlu0 (!%p329_p2), %v1614_v3, %s1653_s25  ;;  %1577 = vmatpush3.bf16.msra.mxu0 (!%p329_p2), %v1576_v6  ;;  %s1656_s17 = smov (!%p329_p2), 104   ;;  %s1658_s23 = smov (!%p329_p2), 80   ;;  %vm1249_vm3 = vcmask (!%p329_p2), 130048   ;;  %vm1251_vm4 = vcmask (!%p329_p2), 195584  }
   0x9   : > { %1578 = vmatprep.subr.bf16.mxu0 (!%p329_p2), %v1650_v5  ;;  %491 = vrot.lane.b32.xlu1 (!%p329_p2), %v1449_v7, %s1653_s25  ;;  %s1659_s24 = smov (!%p329_p2), 72   ;;  %s1662_s18 = smov (!%p329_p2), 24  }
   0xc   : > { %1620 = vrot.lane.b32.xlu0 (!%p329_p2), %v1619_v9, %s1653_s25  ;;  %1580 = vmatpush3.bf16.msra.mxu0 (!%p329_p2), %v1579_v10 }
   0xd   : > { %s1882_s14 = smov (!%p371_p3, %s1441_s14), 1  ;;  %1534 = vmatprep.subr.mxu0 %v1652_v8 }
   0xe   : > { %s1753_s26 = sshll.u32 %s1882_s14, 3  ;;  %s381_s20 = scalar_lea.vmem %s1879_s9, %s1882_s14 }
   0xf   : > { %s374_s29 = scalar_lea.vmem %s1870_s0, %s1753_s26  ;;  %s378_s12 = scalar_lea.vmem %s1871_s1, %s1753_s26  ;;  %v1452_v36 = vld [vmem:[%s381_s20] ss:$0 sm:$0xff] }
  0x10   : > { %v1760_v11 = vld [vmem:[%s374_s29] sm:$0xff]  ;;  %v576_v37 = vadd.f32 %v1452_v36, %v568_v35  ;;  %s1657_s14 = smov 88   ;;  %s385_s27 = scalar_lea.vmem %s1880_s10, %s1753_s26 }
  0x11   : > { %1511 = vmatmul.mubr.msk.f32.vlgmr.msra.gmra.mrb[0].mxu0 %vm401_vm1, %v1760_v11  ;;  %v394_v20 = vld [vmem:[%s378_s12] sm:$0xff] }
  0x12   : > { %1536 = vmatprep.mubr.msk.f32.mxu0 %vm1651_vm0, %v1652_v8 }
  0x7a   : > { %v1616_v12 = vpop.permute.xlu0 %1615 }
  0x7b   : > { %v1618_v13 = vunpack.i.h.bf16 %v1616_v12  ;;  %v1617_v14 = vunpack.i.l.bf16 %v1616_v12  ;;  %v492_v25 = vpop.permute.xlu1 %491 }
  0x7d   : > { %v1582_v15 = vpack.c.bf16 %v1618_v13, %v1617_v14 }
  0x7e   : > { %v1621_v16 = vpop.permute.xlu0 %1620 }
  0x7f   : > { %v1623_v17 = vunpack.i.h.bf16 %v1621_v16  ;;  %v1622_v18 = vunpack.i.l.bf16 %v1621_v16  ;;  %1583 = vmatpush3.bf16.msra.mxu1 %v1582_v15 }
  0x80   : > { %1584 = vmatprep.subr.bf16.mxu1 %v1650_v5 }
  0x81   : > { %v1585_v19 = vpack.c.bf16 %v1623_v17, %v1622_v18 }
  0x83   : > { %1586 = vmatpush3.bf16.msra.mxu1 %v1585_v19 }
  0x84   : > { %1524 = vmatprep.subr.mxu1 %v1652_v8 }
  0x86   : > { %1522 = vmatmul.mubr.msk.f32.vlgmr.msra.gmra.mrb[0].mxu1 %vm401_vm1, %v394_v20 }
  0x87   : > { %1526 = vmatprep.mubr.msk.f32.mxu1 %vm1651_vm0, %v1652_v8 }
  0xe4   : > { %v471_v21 = vpop.f32.mrb[0].mxu0 }
  0xe5   : > { %v472_v22 = vadd.f32 %v1449_v7, %v471_v21  ;;  %v1512_v23 = vpop.f32.mrb[1].mxu0 }
  0xe7   : > { %v567_v24 = vmul.f32 0.35355338, %v472_v22 }
  0xe9   : > { %741 = vrot.lane.b32.xlu0 %v567_v24, %s1654_s15 }
  0xed   : > { %906 = vrot.lane.b32.xlu0 %v567_v24, %s1655_s16 }
  0xf1   : > { %1071 = vrot.lane.b32.xlu0 %v567_v24, %s1656_s17 }
 0x159   : > { %v563_v26 = vpop.f32.mrb[0].mxu1 }
 0x15a   : > { %v1776_v27 = vadd.f32 %v563_v26, %v492_v25  ;;  %v1523_v28 = vpop.f32.mrb[1].mxu1 }
 0x15b   : > { %v742_v29 = vpop.permute.xlu0 %741 }
 0x15c   : > { %743 = vrot.lane.b32.xlu1 %v1776_v27, %s1654_s15  ;;  %1525 = vmatpush3.xpose.msk.msra.mxu1 %vm577_vm2, %v1776_v27 }
 0x15d   : > { %1529 = vmatprep.subr.mxu1 %v1652_v8 }
 0x15f   : > { %1527 = vmatmul.mubr.msk.f32.vlgmr.msra.gmra.mrb[2].mxu1 %vm577_vm2, %v567_v24  ;;  %v907_v32 = vpop.permute.xlu0 %906 }
 0x160   : > { %908 = vrot.lane.b32.xlu1 %v1776_v27, %s1655_s16  ;;  %1531 = vmatprep.mubr.msk.f32.mxu1 %vm1651_vm0, %v1652_v8  ;;  %s1660_s16 = smov 8  }
 0x163   : > { %v1072_v34 = vpop.permute.xlu0 %1071 }
 0x164   : > { %1073 = vrot.lane.b32.xlu1 %v1776_v27, %s1656_s17  ;;  %s1661_s17 = smov 16  }
 0x1ce   : > { %v744_v30 = vpop.permute.xlu1 %743 }
 0x1cf   : > { %1535 = vmatpush3.xpose.msk.msra.mxu0 %vm577_vm2, %v744_v30 }
 0x1d0   : > { %1544 = vmatprep.subr.mxu0 %v1652_v8 }
 0x1d2   : > { %v909_v31 = vpop.permute.xlu1 %908  ;;  %1537 = vmatmul.mubr.msk.f32.vlgmr.msra.gmra.mrb[2].mxu0 %vm577_vm2, %v742_v29 }
 0x1d3   : > { %1545 = vmatpush3.xpose.msk.msra.mxu0 %vm577_vm2, %v909_v31  ;;  %1546 = vmatprep.mubr.msk.f32.mxu0 %vm1651_vm0, %v1652_v8  ;;  %v1253_v31 = vld [vmem:[%s1874_s4] sm:$0xff] }
 0x1d4   : > { %1554 = vmatprep.subr.mxu0 %v1652_v8 }
 0x1d6   : > { %v1074_v33 = vpop.permute.xlu1 %1073  ;;  %1547 = vmatmul.mubr.msk.f32.vlgmr.msra.gmra.mrb[4].mxu0 %vm577_vm2, %v907_v32  ;;  %v1254_v32 = vld [vmem:[%s1874_s4 + $0x8] sm:$0xff] }
 0x1d7   : > { %1555 = vmatpush3.xpose.msk.msra.mxu0 %vm577_vm2, %v1074_v33  ;;  %1556 = vmatprep.mubr.msk.f32.mxu0 %vm1651_vm0, %v1652_v8  ;;  %v1588_v33 = vpack.c.bf16 %v1254_v32, %v1253_v31 }
 0x1d8   : > { %1587 = vmatprep.subr.bf16.mxu0 %v1650_v5 }
 0x1da   : > { %1557 = vmatmul.mubr.msk.f32.vlgmr.msra.gmra.mrb[6].mxu0 %vm577_vm2, %v1072_v34  ;;  %v1256_v34 = vld [vmem:[%s1874_s4 + $0x18] sm:$0xff] }
 0x1db   : > { %1572 = vmatprep.mubr.msk.f32.mxu0 %vm1651_vm0, %v1652_v8  ;;  %1589 = vmatpush3.bf16.msra.mxu0 %v1588_v33 }
 0x1dc   : > { %1590 = vmatprep.subr.bf16.mxu0 %v1650_v5 }
 0x232   : > { %v650_v38 = vpop.f32.mrb[2].mxu1 }
 0x233   : > { %v651_v39 = vadd.f32 %v650_v38, %v576_v37  ;;  %v1528_v40 = vpop.f32.mrb[3].mxu1 }
 0x235   : > { %v654_v41 = vsel %vm577_vm2, %v651_v39, -inf }
 0x236   : > { %655 = vmax.xlane.f32.xlu1 %v654_v41 }
 0x2a5   : > { %v815_v42 = vpop.f32.mrb[2].mxu0 }
 0x2a6   : > { %v816_v43 = vadd.f32 %v815_v42, %v576_v37  ;;  %v1538_v44 = vpop.f32.mrb[3].mxu0 }
 0x2a8   : > { %v819_v45 = vsel %vm577_vm2, %v816_v43, -inf }
 0x2a9   : > { %820 = vmax.xlane.f32.xlu0 %v819_v45  ;;  %v980_v46 = vpop.f32.mrb[4].mxu0 }
 0x2aa   : > { %v981_v47 = vadd.f32 %v980_v46, %v576_v37  ;;  %v1548_v48 = vpop.f32.mrb[5].mxu0 }
 0x2ac   : > { %v984_v49 = vsel %vm577_vm2, %v981_v47, -inf }
 0x2ad   : > { %985 = vmax.xlane.f32.xlu0 %v984_v49  ;;  %v1145_v50 = vpop.f32.mrb[6].mxu0 }
 0x2ae   : > { %v1146_v51 = vadd.f32 %v1145_v50, %v576_v37  ;;  %v1558_v52 = vpop.f32.mrb[7].mxu0 }
 0x2b0   : > { %v1149_v53 = vsel %vm577_vm2, %v1146_v51, -inf }
 0x2b1   : > { %1150 = vmax.xlane.f32.xlu1 %v1149_v53 }
 0x2c2   : > { %830 = vrot.lane.b32.xlu1 %v1776_v27, %s1657_s14 }
 0x2c3   : > { %v656_v54 = vpop.xlane.xlu1 %655 }
 0x2c4   : > { %v657_v55 = vsub.f32 %v651_v39, %v656_v54 }
 0x2c6   : > { %v658_v56 = vmul.f32 1.442695, %v657_v55 }
 0x2c8   : > { %1624 = vpow2.f32 %v658_v56 }
 0x2d2   : > { %v1625_v57 = vpop.eup %1624 }
 0x2d3   : > { %v660_v58 = vsel %vm577_vm2, %v1625_v57, 0.0 }
 0x2d4   : > { %661 = vadd.xlane.f32.xlu0 %v660_v58 }
 0x2ea   : > { %665 = vrot.lane.b32.xlu0 %v1776_v27, %s1653_s25 }
 0x336   : > { %v821_v59 = vpop.xlane.xlu0 %820 }
 0x337   : > { %v822_v60 = vsub.f32 %v816_v43, %v821_v59 }
 0x339   : > { %v823_v61 = vmul.f32 1.442695, %v822_v60 }
 0x33a   : > { %v986_v62 = vpop.xlane.xlu0 %985 }
 0x33b   : > { %1626 = vpow2.f32 %v823_v61  ;;  %v987_v63 = vsub.f32 %v981_v47, %v986_v62  ;;  %v1465_v47 = vld [vmem:[%s1875_s5] ss:$0 sm:$0xff] }
 0x33d   : > { %v988_v0 = vmul.f32 1.442695, %v987_v63  ;;  %v1468_v63 = vld [vmem:[%s1877_s7] ss:$0 sm:$0xff] }
 0x33e   : > { %v1151_v1 = vpop.xlane.xlu1 %1150 }
 0x33f   : > { %1628 = vpow2.f32 %v988_v0  ;;  %v1152_v2 = vsub.f32 %v1146_v51, %v1151_v1 }
 0x341   : > { %v1153_v3 = vmul.f32 1.442695, %v1152_v2 }
 0x342   : > { %v831_v17 = vpop.permute.xlu1 %830 }
 0x343   : > { %1630 = vpow2.f32 %v1153_v3 }
 0x345   : > { %v1627_v4 = vpop.eup %1626 }
 0x346   : > { %v825_v6 = vsel %vm577_vm2, %v1627_v4, 0.0 }
 0x347   : > { %826 = vadd.xlane.f32.xlu1 %v825_v6 }
 0x349   : > { %v1629_v7 = vpop.eup %1628 }
 0x34a   : > { %v990_v9 = vsel %vm577_vm2, %v1629_v7, 0.0 }
 0x34b   : > { %991 = vadd.xlane.f32.xlu0 %v990_v9 }
 0x34d   : > { %v1631_v10 = vpop.eup %1630 }
 0x34e   : > { %v1155_v12 = vsel %vm577_vm2, %v1631_v10, 0.0 }
 0x34f   : > { %1156 = vadd.xlane.f32.xlu1 %v1155_v12 }
 0x360   : > { %995 = vrot.lane.b32.xlu1 %v1776_v27, %s1658_s23 }
 0x361   : > { %1160 = vrot.lane.b32.xlu0 %v1776_v27, %s1659_s24  ;;  %v662_v13 = vpop.xlane.xlu0 %661 }
 0x362   : > { %1632 = vrcp.f32 %v662_v13 }
 0x365   : > { %v666_v14 = vpop.permute.xlu0 %665 }
 0x366   : > { %1530 = vmatpush3.msra.mxu1 %v666_v14 }
 0x367   : > { %1539 = vmatprep.subr.mxu1 %v1652_v8 }
 0x36c   : > { %v1633_v15 = vpop.eup %1632 }
 0x36d   : > { %v664_v16 = vmul.f32 %v1633_v15, %v1625_v57 }
 0x36f   : > { %1532 = vmatmul.mubr.msk.f32.vlgmr.msra.gmra.mrb[4].mxu1 %vm577_vm2, %v664_v16 }
 0x370   : > { %1540 = vmatpush3.msra.mxu1 %v831_v17  ;;  %1541 = vmatprep.mubr.msk.f32.mxu1 %vm1651_vm0, %v1652_v8 }
 0x371   : > { %1549 = vmatprep.subr.mxu1 %v1652_v8 }
 0x3d4   : > { %v827_v18 = vpop.xlane.xlu1 %826 }
 0x3d5   : > { %1634 = vrcp.f32 %v827_v18 }
 0x3d8   : > { %v992_v19 = vpop.xlane.xlu0 %991 }
 0x3d9   : > { %1636 = vrcp.f32 %v992_v19 }
 0x3dc   : > { %v1157_v20 = vpop.xlane.xlu1 %1156  ;;  %v1161_v26 = vpop.permute.xlu0 %1160 }
 0x3dd   : > { %1638 = vrcp.f32 %v1157_v20 }
 0x3df   : > { %v1635_v21 = vpop.eup %1634 }
 0x3e0   : > { %v829_v22 = vmul.f32 %v1635_v21, %v1627_v4  ;;  %v996_v23 = vpop.permute.xlu1 %995 }
 0x3e2   : > { %1542 = vmatmul.mubr.msk.f32.vlgmr.msra.gmra.mrb[6].mxu1 %vm577_vm2, %v829_v22 }
 0x3e3   : > { %v1637_v24 = vpop.eup %1636  ;;  %1550 = vmatpush3.msra.mxu1 %v996_v23  ;;  %1551 = vmatprep.mubr.msk.f32.mxu1 %vm1651_vm0, %v1652_v8 }
 0x3e4   : > { %v994_v25 = vmul.f32 %v1637_v24, %v1629_v7  ;;  %1559 = vmatprep.subr.mxu1 %v1652_v8 }
 0x3e6   : > { %1552 = vmatmul.mubr.msk.f32.vlgmr.msra.gmra.mrb[8].mxu1 %vm577_vm2, %v994_v25 }
 0x3e7   : > { %v1639_v27 = vpop.eup %1638  ;;  %1560 = vmatpush3.msra.mxu1 %v1161_v26  ;;  %1561 = vmatprep.mubr.msk.f32.mxu1 %vm1651_vm0, %v1652_v8  ;;  %v1255_v8 = vld [vmem:[%s1874_s4 + $0x10] sm:$0xff] }
 0x3e8   : > { %v1159_v28 = vmul.f32 %v1639_v27, %v1631_v10  ;;  %v1591_v35 = vpack.c.bf16 %v1256_v34, %v1255_v8 }
 0x3ea   : > { %1562 = vmatmul.mubr.msk.f32.vlgmr.msra.gmra.mrb[10].mxu1 %vm577_vm2, %v1159_v28  ;;  %1592 = vmatpush3.bf16.msra.mxu0 %v1591_v35 }
 0x442   : > { %v737_v29 = vpop.f32.mrb[4].mxu1 }
 0x443   : > { %v1533_v30 = vpop.f32.mrb[5].mxu1 }
 0x4b5   : > { %v902_v36 = vpop.f32.mrb[6].mxu1 }
 0x4b6   : > { %1237 = vrot.lane.b32.xlu1 %v902_v36, %s1660_s16  ;;  %v1543_v37 = vpop.f32.mrb[7].mxu1 }
 0x4b9   : > { %v1067_v38 = vpop.f32.mrb[8].mxu1 }
 0x4ba   : > { %1241 = vrot.lane.b32.xlu0 %v1067_v38, %s1661_s17  ;;  %v1553_v39 = vpop.f32.mrb[9].mxu1 }
 0x4bd   : > { %v1232_v40 = vpop.f32.mrb[10].mxu1 }
 0x4be   : > { %1245 = vrot.lane.b32.xlu1 %v1232_v40, %s1662_s18  ;;  %v1563_v5 = vpop.f32.mrb[11].mxu1 }
 0x528   : > { %v1238_v41 = vpop.permute.xlu1 %1237 }
 0x529   : > { %v1248_v43 = vsel %vm577_vm2, %v737_v29, %v1238_v41 }
 0x52c   : > { %v1242_v42 = vpop.permute.xlu0 %1241 }
 0x52d   : > { %v1250_v44 = vsel %vm1249_vm3, %v1248_v43, %v1242_v42 }
 0x530   : > { %v1246_v45 = vpop.permute.xlu1 %1245 }
 0x531   : > { %v1252_v46 = vsel %vm1251_vm4, %v1250_v44, %v1246_v45 }
 0x532   : > { %1573 = vmatmul.mubr.msk.f32.vlgmr.msra.gmra.mrb[8].mxu0 %vm401_vm1, %v1252_v46 }
 0x605   : > { %v1333_v48 = vpop.f32.mrb[8].mxu0 }
 0x606   : > { %v1334_v49 = vadd.f32 %v1465_v47, %v1333_v48  ;;  %v1574_v50 = vpop.f32.mrb[9].mxu0 }
 0x608   : > { %v1337_v51 = vadd.f32 %v1334_v49, %v1760_v11  ;;  %v1467_v11 = vld [vmem:[%s1876_s6] ss:$0 sm:$0xff] }
 0x60a   : > { %v1338_v52 = vsel %vm401_vm1, %v1337_v51, 0.0 }
 0x60b   : > { %1339 = vadd.xlane.f32.xlu0 %v1338_v52 }
 0x698   : > { %v1340_v53 = vpop.xlane.xlu0 %1339 }
 0x699   : > { %v1342_v54 = vmul.f32 0.03125, %v1340_v53 }
 0x69b   : > { %v1343_v55 = vsub.f32 %v1337_v51, %v1342_v54 }
 0x69d   : > { %v1344_v56 = vmul.f32 %v1343_v55, %v1343_v55 }
 0x69f   : > { %v1345_v57 = vsel %vm401_vm1, %v1344_v56, 0.0 }
 0x6a0   : > { %1346 = vadd.xlane.f32.xlu1 %v1345_v57 }
 0x72d   : > { %v1347_v58 = vpop.xlane.xlu1 %1346 }
 0x72e   : > { %v1348_v59 = vmul.f32 0.03125, %v1347_v58 }
 0x730   : > { %v1349_v60 = vadd.f32 1e-05, %v1348_v59 }
 0x732   : > { %1640 = vrsqrt.f32 %v1349_v60 }
 0x73c   : > { %v1641_v61 = vpop.eup %1640 }
 0x73d   : > { %v1351_v62 = vmul.f32 %v1641_v61, %v1343_v55 }
 0x73f   : > { %v1358_v0 = vmul.f32 %v1467_v11, %v1351_v62 }
 0x741   : > { %v1365_v1 = vadd.f32 %v1468_v63, %v1358_v0 }
 0x743   : > { %1366 = vst.msk [vmem:[%s385_s27] sm:$0xff] %vm401_vm1, %v1365_v1 }
 0x744 PF: > { %s20_s13 = sadd.s32 1, %s1648_s13  }
 0x745   : > { %p17_p4 = scmp.ge.s32.totalorder %s20_s13, 4  }
 0x747   :  { %19 = sbr.rel (!%p17_p4) target bundleno = 1 (0x1), region = 96 }

</bundles_post_ra>
